<compile_context>
chip_gen: v7x
topology: tpu7x:2x2x1
jax: 0.10.0
libtpu: 0.0.40
codegen_flags: <defaults>
</compile_context>

<pallas_src>
import functools

import jax
import jax.numpy as jnp
from jax.experimental import pallas as pl
from jax.experimental.pallas import tpu as pltpu

EPS = 1e-6  # nn.LayerNorm(..., eps=1e-06)


def _layer_norm(v, g, b):
    mu = jnp.mean(v, axis=-1, keepdims=True)
    var = jnp.mean((v - mu) ** 2, axis=-1, keepdims=True)
    return (v - mu) * jax.lax.rsqrt(var + EPS) * g + b


# ----------------------------------------------------------------------------
# Fused Pallas kernel: all encoder layers + final LayerNorm
# grid = (B//Bb, L); batch-block axis "parallel", layer axis "arbitrary".
# The (Bb*T, D) residual stream stays resident in a VMEM scratch across layers.
# ----------------------------------------------------------------------------
def fused_encoder_kernel(x_ref, bias_ref,
                         ln1_g, ln1_b,
                         wq, bq, wk, bk, wv, bv, wo, bo,
                         ln2_g, ln2_b,
                         w1, b1, w2, b2,
                         fln_g, fln_b,
                         o_ref, x_sc, ctx_sc, *, num_heads, resident):
    l = pl.program_id(1)
    n_layers = pl.num_programs(1)
    # Weight stacks are either fully VMEM-resident (index the layer axis dynamically)
    # or delivered one layer at a time by the BlockSpec pipeline (index 0).
    li = l if resident else 0

    Bb, T, D = x_ref.shape
    Dh = D // num_heads
    M = Bb * T

    # Load the batch block into the resident scratch once (flattened M-dim).
    @pl.when(l == 0)
    def _():
        x_sc[...] = x_ref[...].reshape(M, D)

    x = x_sc[...]                                    # (M, D) f32 residual stream
    bias = bias_ref[...]                             # (Bb, 1, T) additive key-mask bias

    # ---- multi-head self-attention (pre-LN) ----
    xn = _layer_norm(x, ln1_g[li], ln1_b[li])        # f32 statistics
    xb = xn.astype(jnp.bfloat16)
    wo_l = wo[li]
    q = jnp.dot(xb, wq[li], preferred_element_type=jnp.float32) + bq[li]
    k = jnp.dot(xb, wk[li], preferred_element_type=jnp.float32) + bk[li]
    v = jnp.dot(xb, wv[li], preferred_element_type=jnp.float32) + bv[li]
    q = q * (1.0 / jnp.sqrt(jnp.float32(Dh)))        # scale folded in once
    # Cast once as full (M, D) arrays (no per-head sub-vreg casts).
    qb = q.astype(jnp.bfloat16)
    kb = k.astype(jnp.bfloat16)
    vb = v.astype(jnp.bfloat16)

    # Per-(sequence, head) attention; contexts written into a lane-contiguous
    # (M, D) scratch so the output projection is a single K=D matmul.
    # TODO(synk): switch to flash-style key tiling / batched dot_general at large T.
    for b in range(Bb):
        rows = slice(b * T, (b + 1) * T)
        q_b = qb[rows]
        k_b = kb[rows]
        v_b = vb[rows]
        bias_b = bias[b]                              # (1, T)
        for h in range(num_heads):
            cols = slice(h * Dh, (h + 1) * Dh)
            s = jnp.einsum('td,sd->ts', q_b[:, cols], k_b[:, cols],
                           preferred_element_type=jnp.float32)       # (T, T) f32
            s = s + bias_b                            # mask padded keys
            m = jnp.max(s, axis=-1, keepdims=True)
            p = jnp.exp(s - m)
            inv = pl.reciprocal(jnp.sum(p, axis=-1, keepdims=True), approx=True)
            ctx = jnp.dot(p.astype(jnp.bfloat16), v_b[:, cols],
                          preferred_element_type=jnp.float32)        # (T, Dh)
            # Scale the small context, not the (T, T) probability matrix.
            ctx_sc[rows, cols] = ctx * inv

    att_out = jnp.dot(ctx_sc[...].astype(jnp.bfloat16), wo_l,
                      preferred_element_type=jnp.float32) + bo[li]

    h1 = x + att_out                                  # residual (dropout p=0)

    # ---- position-wise feed-forward (pre-LN, residual inside) ----
    hn = _layer_norm(h1, ln2_g[li], ln2_b[li])
    f = jnp.dot(hn.astype(jnp.bfloat16), w1[li],
                preferred_element_type=jnp.float32) + b1[li]
    f = jnp.maximum(f, 0.0)                           # ReLU
    f = jnp.dot(f.astype(jnp.bfloat16), w2[li],
                preferred_element_type=jnp.float32) + b2[li]

    x_new = h1 + f
    x_sc[...] = x_new

    # Final LayerNorm fused into the last layer step.
    @pl.when(l == n_layers - 1)
    def _():
        o_ref[...] = _layer_norm(x_new, fln_g[...], fln_b[...]).reshape(Bb, T, D)


# ----------------------------------------------------------------------------
# Wrapper (pallas_call plumbing + generation-aware tiling decisions)
# ----------------------------------------------------------------------------
def _vmem_budget_bytes():
    """~85% of physical VMEM (v5e/v6e: 128 MiB, v7x: 64 MiB), with a safe fallback."""
    try:
        info = pltpu.get_tpu_info()
        cap = getattr(info, "vmem_capacity_bytes", None) or getattr(info, "vmem_bytes", None)
        if cap:
            return int(min(cap * 0.85, 104 * 1024 * 1024))
    except Exception:
        pass
    return 56 * 1024 * 1024   # conservative: valid on every generation incl. v7x


def transformer_encoder_forward(embed_src, src_length, params, num_heads,
                                vmem_limit_bytes=None, block_batch=None):
    B, T, D = embed_src.shape
    F = params['w1'].shape[-1]
    L = params['wq'].shape[0]

    if vmem_limit_bytes is None:
        vmem_limit_bytes = _vmem_budget_bytes()

    # --- resident-weight decision (DMA the whole bf16 stack once if it fits) ---
    weight_bytes = L * (4 * D * D + 2 * D * F) * 2       # bf16 matrices
    weight_bytes += L * (9 * D + F) * 4                  # f32 LN params / biases
    resident = weight_bytes <= vmem_limit_bytes // 3     # leave >=2/3 for activations

    if resident:
        w_step_bytes = weight_bytes                      # resident for whole kernel
    else:
        w_step_bytes = 2 * ((4 * D * D + 2 * D * F) * 2 + (9 * D + F) * 4)  # 2x buffered

    # --- batch-block (Bb) selection: amortize weight DMA, grow the matmul M-dim ---
    if block_batch is None:
        per_seq = (T * D * 4          # residual scratch
                   + T * D * 4        # context scratch
                   + 3 * T * D * 4    # q/k/v
                   + T * F * 4        # FFN intermediate
                   + 4 * T * D * 4)   # double-buffered input & output blocks
        fixed = w_step_bytes + 2 * T * T * 4 + (2 << 20)
        max_bb = max(1, (vmem_limit_bytes - fixed) // per_seq)
        block_batch = 1
        for cand in range(1, B + 1):
            if B % cand == 0 and cand <= max_bb:
                block_batch = cand
    Bb = block_batch
    assert B % Bb == 0, "block_batch must divide batch size"
    # NOTE: on v7x (2 TensorCores) prefer Bb such that B//Bb >= 2 so both cores get work.

    valid = create_mask(src_length, T)                                  # (B,1,T)
    mask_bias = jnp.where(valid, 0.0, -1e9).astype(jnp.float32)         # additive
    x = (embed_src + sinusoidal_pe(T, D)[None]).astype(jnp.float32)     # pe='ape'
    # emb_dropout / layer dropout: p=0 (eval) -> identity

    if resident:
        lay_vec = lambda n: pl.BlockSpec((L, 1, n), lambda b, l: (0, 0, 0))
        lay_mat = lambda m, n: pl.BlockSpec((L, m, n), lambda b, l: (0, 0, 0))
    else:
        lay_vec = lambda n: pl.BlockSpec((1, 1, n), lambda b, l: (l, 0, 0))
        lay_mat = lambda m, n: pl.BlockSpec((1, m, n), lambda b, l: (l, 0, 0))

    in_specs = [
        pl.BlockSpec((Bb, T, D), lambda b, l: (b, 0, 0)),   # x (Bb sequences per step)
        pl.BlockSpec((Bb, 1, T), lambda b, l: (b, 0, 0)),   # additive mask bias
        lay_vec(D), lay_vec(D),                             # ln1 gamma/beta
        lay_mat(D, D), lay_vec(D), lay_mat(D, D), lay_vec(D),   # Wq,bq,Wk,bk
        lay_mat(D, D), lay_vec(D), lay_mat(D, D), lay_vec(D),   # Wv,bv,Wo,bo
        lay_vec(D), lay_vec(D),                             # ln2 gamma/beta
        lay_mat(D, F), lay_vec(F), lay_mat(F, D), lay_vec(D),   # W1,b1,W2,b2
        pl.BlockSpec((1, D), lambda b, l: (0, 0)),          # final LN gamma
        pl.BlockSpec((1, D), lambda b, l: (0, 0)),          # final LN beta
    ]

    grid_spec = pltpu.PrefetchScalarGridSpec(
        num_scalar_prefetch=0,
        grid=(B // Bb, L),
        in_specs=in_specs,
        out_specs=pl.BlockSpec((Bb, T, D), lambda b, l: (b, 0, 0)),
        scratch_shapes=[pltpu.VMEM((Bb * T, D), jnp.float32),    # resident residual
                        pltpu.VMEM((Bb * T, D), jnp.float32)],   # attention context
    )

    return pl.pallas_call(
        functools.partial(fused_encoder_kernel, num_heads=num_heads, resident=resident),
        out_shape=jax.ShapeDtypeStruct((B, T, D), jnp.float32),
        grid_spec=grid_spec,
        compiler_params=pltpu.CompilerParams(
            dimension_semantics=("parallel", "arbitrary"),
            vmem_limit_bytes=int(vmem_limit_bytes),
        ),
    )(x, mask_bias,
      params['ln1_g'], params['ln1_b'],
      params['wq'], params['bq'], params['wk'], params['bk'],
      params['wv'], params['bv'], params['wo'], params['bo'],
      params['ln2_g'], params['ln2_b'],
      params['w1'], params['b1'], params['w2'], params['b2'],
      params['fln_g'], params['fln_b'])
    # need_cls_token is None -> module returns (layer_norm(x), plot_lst); plots omitted.
    # TODO(synk): need_att attention-map plotting outputs not materialized.


# ----------------------------------------------------------------------------
# Glue: positional encoding, mask, parameter init
# ----------------------------------------------------------------------------
def sinusoidal_pe(T, D):
    pos = jnp.arange(T, dtype=jnp.float32)[:, None]
    div = jnp.exp(jnp.arange(0, D, 2, dtype=jnp.float32) * -(jnp.log(10000.0) / D))
    pe = jnp.zeros((T, D), jnp.float32)
    pe = pe.at[:, 0::2].set(jnp.sin(pos * div))
    pe = pe.at[:, 1::2].set(jnp.cos(pos * div))
    return pe


def create_mask(src_length, T):
    # (B, 1, T), True where position < length (valid token)
    return (jnp.arange(T)[None, :] < src_length[:, None])[:, None, :]


def init_params(key, num_layers, D, F):
    def dense(k, fan_in, fan_out):
        lim = 1.0 / jnp.sqrt(jnp.float32(fan_in))
        return jax.random.uniform(k, (fan_in, fan_out), jnp.float32, -lim, lim)

    wq, wk, wv, wo, w1, w2 = [], [], [], [], [], []
    for _ in range(num_layers):
        key, *ks = jax.random.split(key, 7)
        wq.append(dense(ks[0], D, D)); wk.append(dense(ks[1], D, D))
        wv.append(dense(ks[2], D, D)); wo.append(dense(ks[3], D, D))
        w1.append(dense(ks[4], D, F)); w2.append(dense(ks[5], F, D))

    stack_bf16 = lambda lst: jnp.stack(lst).astype(jnp.bfloat16)
    L = num_layers
    return dict(
        ln1_g=jnp.ones((L, 1, D), jnp.float32), ln1_b=jnp.zeros((L, 1, D), jnp.float32),
        ln2_g=jnp.ones((L, 1, D), jnp.float32), ln2_b=jnp.zeros((L, 1, D), jnp.float32),
        wq=stack_bf16(wq), wk=stack_bf16(wk), wv=stack_bf16(wv), wo=stack_bf16(wo),
        w1=stack_bf16(w1), w2=stack_bf16(w2),
        bq=jnp.zeros((L, 1, D), jnp.float32), bk=jnp.zeros((L, 1, D), jnp.float32),
        bv=jnp.zeros((L, 1, D), jnp.float32), bo=jnp.zeros((L, 1, D), jnp.float32),
        b1=jnp.zeros((L, 1, F), jnp.float32), b2=jnp.zeros((L, 1, D), jnp.float32),
        fln_g=jnp.ones((1, D), jnp.float32), fln_b=jnp.zeros((1, D), jnp.float32),
    )


# ----------------------------------------------------------------------------
# Pure-JAX reference (same math, same bf16 matmul-input precision)
# ----------------------------------------------------------------------------
def _reference_forward(embed_src, src_length, p, num_heads):
    B, T, D = embed_src.shape
    Dh = D // num_heads
    L = p['wq'].shape[0]
    bf = lambda a: a.astype(jnp.bfloat16)

    valid = create_mask(src_length, T)
    bias = jnp.where(valid, 0.0, -1e9).astype(jnp.float32)[:, :, None, :]  # (B,1,1,T)
    x = embed_src + sinusoidal_pe(T, D)[None]
    for l in range(L):
        xn = _layer_norm(x, p['ln1_g'][l], p['ln1_b'][l])
        q = jnp.einsum('btd,de->bte', bf(xn), p['wq'][l],
                       preferred_element_type=jnp.float32) + p['bq'][l]
        k = jnp.einsum('btd,de->bte', bf(xn), p['wk'][l],
                       preferred_element_type=jnp.float32) + p['bk'][l]
        v = jnp.einsum('btd,de->bte', bf(xn), p['wv'][l],
                       preferred_element_type=jnp.float32) + p['bv'][l]
        q = q / jnp.sqrt(jnp.float32(Dh))
        qh = q.reshape(B, T, num_heads, Dh).transpose(0, 2, 1, 3)
        kh = k.reshape(B, T, num_heads, Dh).transpose(0, 2, 1, 3)
        vh = v.reshape(B, T, num_heads, Dh).transpose(0, 2, 1, 3)
        s = jnp.einsum('bhtd,bhsd->bhts', bf(qh), bf(kh),
                       preferred_element_type=jnp.float32) + bias
        a = jax.nn.softmax(s, axis=-1)
        ctx = jnp.einsum('bhts,bhsd->bhtd', bf(a), bf(vh),
                         preferred_element_type=jnp.float32)
        ctx = ctx.transpose(0, 2, 1, 3).reshape(B, T, D)
        att_out = jnp.einsum('btd,de->bte', bf(ctx), p['wo'][l],
                             preferred_element_type=jnp.float32) + p['bo'][l]
        h = x + att_out
        hn = _layer_norm(h, p['ln2_g'][l], p['ln2_b'][l])
        f = jnp.einsum('btd,df->btf', bf(hn), p['w1'][l],
                       preferred_element_type=jnp.float32) + p['b1'][l]
        f = jnp.maximum(f, 0.0)
        f = jnp.einsum('btf,fd->btd', bf(f), p['w2'][l],
                       preferred_element_type=jnp.float32) + p['b2'][l]
        x = h + f
    return _layer_norm(x, p['fln_g'], p['fln_b'])


if __name__ == "__main__":
    # batch, seq, tf_model_size, num_heads, tf_ff_size, num_layers
    B, T, D, H, F, L = 2, 8, 32, 4, 64, 2

    key = jax.random.PRNGKey(0)
    k_x, k_p = jax.random.split(key)
    embed_src = jax.random.normal(k_x, (B, T, D), jnp.float32)
    src_length = jnp.array([T, T - 3], dtype=jnp.int32)

    params = init_params(k_p, L, D, F)

    out = transformer_encoder_forward(embed_src, src_length, params, H)
    out = jax.block_until_ready(out)

    ref = _reference_forward(embed_src, src_length, params, H)
    assert out.shape == (B, T, D)
    max_err = float(jnp.max(jnp.abs(out - ref)))
    assert jnp.allclose(out, ref, atol=2e-2, rtol=2e-2), f"mismatch vs reference (max err {max_err})"

    print("KERNEL_OK")
</pallas_src>

<mosaic_0001>
module attributes {stable_mosaic.version = 11 : i64} {
  func.func @fused_encoder_kernel(%arg0: i32, %arg1: i32, %arg2: memref<2x8x32xf32, #tpu.memory_space<vmem>>, %arg3: memref<2x1x8xf32, #tpu.memory_space<vmem>>, %arg4: memref<2x1x32xf32, #tpu.memory_space<vmem>>, %arg5: memref<2x1x32xf32, #tpu.memory_space<vmem>>, %arg6: memref<2x32x32xbf16, #tpu.memory_space<vmem>>, %arg7: memref<2x1x32xf32, #tpu.memory_space<vmem>>, %arg8: memref<2x32x32xbf16, #tpu.memory_space<vmem>>, %arg9: memref<2x1x32xf32, #tpu.memory_space<vmem>>, %arg10: memref<2x32x32xbf16, #tpu.memory_space<vmem>>, %arg11: memref<2x1x32xf32, #tpu.memory_space<vmem>>, %arg12: memref<2x32x32xbf16, #tpu.memory_space<vmem>>, %arg13: memref<2x1x32xf32, #tpu.memory_space<vmem>>, %arg14: memref<2x1x32xf32, #tpu.memory_space<vmem>>, %arg15: memref<2x1x32xf32, #tpu.memory_space<vmem>>, %arg16: memref<2x32x64xbf16, #tpu.memory_space<vmem>>, %arg17: memref<2x1x64xf32, #tpu.memory_space<vmem>>, %arg18: memref<2x64x32xbf16, #tpu.memory_space<vmem>>, %arg19: memref<2x1x32xf32, #tpu.memory_space<vmem>>, %arg20: memref<1x32xf32, #tpu.memory_space<vmem>>, %arg21: memref<1x32xf32, #tpu.memory_space<vmem>>, %arg22: memref<2x8x32xf32, #tpu.memory_space<vmem>>, %arg23: memref<16x32xf32, #tpu.memory_space<vmem>>, %arg24: memref<16x32xf32, #tpu.memory_space<vmem>>) attributes {dimension_semantics = [#tpu.dimension_semantics<parallel>, #tpu.dimension_semantics<arbitrary>], iteration_bounds = array<i64: 1, 2>, scalar_prefetch = 0 : i64, scratch_operands = 2 : i64, tpu.core_type = #tpu.core_type<tc>, window_params = [{transform_indices = @transform_0, window_bounds = array<i64: 2, 8, 32>}, {transform_indices = @transform_1, window_bounds = array<i64: 2, 1, 8>}, {pipeline_mode = #tpu.pipeline_mode<synchronous>, transform_indices = @transform_2, window_bounds = array<i64: 2, 1, 32>}, {pipeline_mode = #tpu.pipeline_mode<synchronous>, transform_indices = @transform_3, window_bounds = array<i64: 2, 1, 32>}, {pipeline_mode = #tpu.pipeline_mode<synchronous>, transform_indices = @transform_4, window_bounds = array<i64: 2, 32, 32>}, {pipeline_mode = #tpu.pipeline_mode<synchronous>, transform_indices = @transform_5, window_bounds = array<i64: 2, 1, 32>}, {pipeline_mode = #tpu.pipeline_mode<synchronous>, transform_indices = @transform_6, window_bounds = array<i64: 2, 32, 32>}, {pipeline_mode = #tpu.pipeline_mode<synchronous>, transform_indices = @transform_7, window_bounds = array<i64: 2, 1, 32>}, {pipeline_mode = #tpu.pipeline_mode<synchronous>, transform_indices = @transform_8, window_bounds = array<i64: 2, 32, 32>}, {pipeline_mode = #tpu.pipeline_mode<synchronous>, transform_indices = @transform_9, window_bounds = array<i64: 2, 1, 32>}, {pipeline_mode = #tpu.pipeline_mode<synchronous>, transform_indices = @transform_10, window_bounds = array<i64: 2, 32, 32>}, {pipeline_mode = #tpu.pipeline_mode<synchronous>, transform_indices = @transform_11, window_bounds = array<i64: 2, 1, 32>}, {pipeline_mode = #tpu.pipeline_mode<synchronous>, transform_indices = @transform_12, window_bounds = array<i64: 2, 1, 32>}, {pipeline_mode = #tpu.pipeline_mode<synchronous>, transform_indices = @transform_13, window_bounds = array<i64: 2, 1, 32>}, {pipeline_mode = #tpu.pipeline_mode<synchronous>, transform_indices = @transform_14, window_bounds = array<i64: 2, 32, 64>}, {pipeline_mode = #tpu.pipeline_mode<synchronous>, transform_indices = @transform_15, window_bounds = array<i64: 2, 1, 64>}, {pipeline_mode = #tpu.pipeline_mode<synchronous>, transform_indices = @transform_16, window_bounds = array<i64: 2, 64, 32>}, {pipeline_mode = #tpu.pipeline_mode<synchronous>, transform_indices = @transform_17, window_bounds = array<i64: 2, 1, 32>}, {pipeline_mode = #tpu.pipeline_mode<synchronous>, transform_indices = @transform_18, window_bounds = array<i64: 1, 32>}, {pipeline_mode = #tpu.pipeline_mode<synchronous>, transform_indices = @transform_19, window_bounds = array<i64: 1, 32>}, {transform_indices = @transform_20, window_bounds = array<i64: 2, 8, 32>}]} {
    %c0_i32 = arith.constant 0 : i32
    %0 = arith.cmpi eq, %arg1, %c0_i32 : i32
    %1 = arith.extui %0 : i1 to i32
    %c0_i32_0 = arith.constant 0 : i32
    %2 = arith.cmpi ne, %1, %c0_i32_0 : i32
    scf.if %2 {
      %c0_105 = arith.constant 0 : index
      %c0_106 = arith.constant 0 : index
      %c0_107 = arith.constant 0 : index
      %297 = vector.load %arg2[%c0_105, %c0_106, %c0_107] : memref<2x8x32xf32, #tpu.memory_space<vmem>>, vector<2x8x32xf32>
      %298 = vector.shape_cast %297 : vector<2x8x32xf32> to vector<16x32xf32>
      %c0_108 = arith.constant 0 : index
      %c0_109 = arith.constant 0 : index
      %299 = vector.load %arg23[%c0_108, %c0_109] : memref<16x32xf32, #tpu.memory_space<vmem>>, vector<16x32xf32>
      tpu.vector_store %arg23[%c0_108, %c0_109], %298 {strides = array<i32>} : memref<16x32xf32, #tpu.memory_space<vmem>>, vector<16x32xf32>,
    } else {
    }
    %c0 = arith.constant 0 : index
    %c0_1 = arith.constant 0 : index
    %3 = vector.load %arg23[%c0, %c0_1] : memref<16x32xf32, #tpu.memory_space<vmem>>, vector<16x32xf32>
    %c0_2 = arith.constant 0 : index
    %c0_3 = arith.constant 0 : index
    %c0_4 = arith.constant 0 : index
    %4 = vector.load %arg3[%c0_2, %c0_3, %c0_4] : memref<2x1x8xf32, #tpu.memory_space<vmem>>, vector<2x1x8xf32>
    %5 = arith.index_cast %arg1 : i32 to index
    %c0_5 = arith.constant 0 : index
    %c0_6 = arith.constant 0 : index
    %6 = vector.load %arg4[%5, %c0_5, %c0_6] : memref<2x1x32xf32, #tpu.memory_space<vmem>>, vector<1x1x32xf32>
    %7 = vector.shape_cast %6 : vector<1x1x32xf32> to vector<1x32xf32>
    %8 = arith.index_cast %arg1 : i32 to index
    %c0_7 = arith.constant 0 : index
    %c0_8 = arith.constant 0 : index
    %9 = vector.load %arg5[%8, %c0_7, %c0_8] : memref<2x1x32xf32, #tpu.memory_space<vmem>>, vector<1x1x32xf32>
    %10 = vector.shape_cast %9 : vector<1x1x32xf32> to vector<1x32xf32>
    %cst = arith.constant dense<0.000000e+00> : vector<16xf32>
    %11 = vector.multi_reduction <add>, %3, %cst [1] : vector<16x32xf32> to vector<16xf32>
    %12 = vector.shape_cast %11 : vector<16xf32> to vector<16x1xf32>
    %cst_9 = arith.constant 3.200000e+01 : f32
    %13 = vector.broadcast %cst_9 : f32 to vector<16x1xf32>
    %14 = arith.divf %12, %13 : vector<16x1xf32>
    %15 = vector.broadcast %14 : vector<16x1xf32> to vector<16x32xf32>
    %16 = arith.subf %3, %15 : vector<16x32xf32>
    %17 = arith.mulf %16, %16 : vector<16x32xf32>
    %cst_10 = arith.constant dense<0.000000e+00> : vector<16xf32>
    %18 = vector.multi_reduction <add>, %17, %cst_10 [1] : vector<16x32xf32> to vector<16xf32>
    %19 = vector.shape_cast %18 : vector<16xf32> to vector<16x1xf32>
    %cst_11 = arith.constant 3.200000e+01 : f32
    %20 = vector.broadcast %cst_11 : f32 to vector<16x1xf32>
    %21 = arith.divf %19, %20 : vector<16x1xf32>
    %22 = vector.broadcast %14 : vector<16x1xf32> to vector<16x32xf32>
    %23 = arith.subf %3, %22 : vector<16x32xf32>
    %cst_12 = arith.constant 9.99999997E-7 : f32
    %24 = vector.broadcast %cst_12 : f32 to vector<16x1xf32>
    %25 = arith.addf %21, %24 : vector<16x1xf32>
    %26 = math.rsqrt %25 : vector<16x1xf32>
    %27 = vector.broadcast %26 : vector<16x1xf32> to vector<16x32xf32>
    %28 = arith.mulf %23, %27 : vector<16x32xf32>
    %29 = vector.broadcast %7 : vector<1x32xf32> to vector<16x32xf32>
    %30 = arith.mulf %28, %29 : vector<16x32xf32>
    %31 = vector.broadcast %10 : vector<1x32xf32> to vector<16x32xf32>
    %32 = arith.addf %30, %31 : vector<16x32xf32>
    %33 = arith.truncf %32 : vector<16x32xf32> to vector<16x32xbf16>
    %34 = arith.index_cast %arg1 : i32 to index
    %c0_13 = arith.constant 0 : index
    %c0_14 = arith.constant 0 : index
    %35 = vector.load %arg12[%34, %c0_13, %c0_14] : memref<2x32x32xbf16, #tpu.memory_space<vmem>>, vector<1x32x32xbf16>
    %36 = vector.shape_cast %35 : vector<1x32x32xbf16> to vector<32x32xbf16>
    %37 = arith.index_cast %arg1 : i32 to index
    %c0_15 = arith.constant 0 : index
    %c0_16 = arith.constant 0 : index
    %38 = vector.load %arg6[%37, %c0_15, %c0_16] : memref<2x32x32xbf16, #tpu.memory_space<vmem>>, vector<1x32x32xbf16>
    %39 = vector.shape_cast %38 : vector<1x32x32xbf16> to vector<32x32xbf16>
    %cst_17 = arith.constant dense<0.000000e+00> : vector<16x32xf32>
    %40 = tpu.matmul %33, %39, %cst_17 {dimension_numbers = #tpu.dot_dimension_numbers<[1], [0], [0], [1], [0, 0, 1, 1], [], []>} : vector<16x32xbf16>, vector<32x32xbf16>, vector<16x32xf32> -> vector<16x32xf32>
    %41 = arith.index_cast %arg1 : i32 to index
    %c0_18 = arith.constant 0 : index
    %c0_19 = arith.constant 0 : index
    %42 = vector.load %arg7[%41, %c0_18, %c0_19] : memref<2x1x32xf32, #tpu.memory_space<vmem>>, vector<1x1x32xf32>
    %43 = vector.shape_cast %42 : vector<1x1x32xf32> to vector<1x32xf32>
    %44 = vector.broadcast %43 : vector<1x32xf32> to vector<16x32xf32>
    %45 = arith.addf %40, %44 : vector<16x32xf32>
    %46 = arith.index_cast %arg1 : i32 to index
    %c0_20 = arith.constant 0 : index
    %c0_21 = arith.constant 0 : index
    %47 = vector.load %arg8[%46, %c0_20, %c0_21] : memref<2x32x32xbf16, #tpu.memory_space<vmem>>, vector<1x32x32xbf16>
    %48 = vector.shape_cast %47 : vector<1x32x32xbf16> to vector<32x32xbf16>
    %cst_22 = arith.constant dense<0.000000e+00> : vector<16x32xf32>
    %49 = tpu.matmul %33, %48, %cst_22 {dimension_numbers = #tpu.dot_dimension_numbers<[1], [0], [0], [1], [0, 0, 1, 1], [], []>} : vector<16x32xbf16>, vector<32x32xbf16>, vector<16x32xf32> -> vector<16x32xf32>
    %50 = arith.index_cast %arg1 : i32 to index
    %c0_23 = arith.constant 0 : index
    %c0_24 = arith.constant 0 : index
    %51 = vector.load %arg9[%50, %c0_23, %c0_24] : memref<2x1x32xf32, #tpu.memory_space<vmem>>, vector<1x1x32xf32>
    %52 = vector.shape_cast %51 : vector<1x1x32xf32> to vector<1x32xf32>
    %53 = vector.broadcast %52 : vector<1x32xf32> to vector<16x32xf32>
    %54 = arith.addf %49, %53 : vector<16x32xf32>
    %55 = arith.index_cast %arg1 : i32 to index
    %c0_25 = arith.constant 0 : index
    %c0_26 = arith.constant 0 : index
    %56 = vector.load %arg10[%55, %c0_25, %c0_26] : memref<2x32x32xbf16, #tpu.memory_space<vmem>>, vector<1x32x32xbf16>
    %57 = vector.shape_cast %56 : vector<1x32x32xbf16> to vector<32x32xbf16>
    %cst_27 = arith.constant dense<0.000000e+00> : vector<16x32xf32>
    %58 = tpu.matmul %33, %57, %cst_27 {dimension_numbers = #tpu.dot_dimension_numbers<[1], [0], [0], [1], [0, 0, 1, 1], [], []>} : vector<16x32xbf16>, vector<32x32xbf16>, vector<16x32xf32> -> vector<16x32xf32>
    %59 = arith.index_cast %arg1 : i32 to index
    %c0_28 = arith.constant 0 : index
    %c0_29 = arith.constant 0 : index
    %60 = vector.load %arg11[%59, %c0_28, %c0_29] : memref<2x1x32xf32, #tpu.memory_space<vmem>>, vector<1x1x32xf32>
    %61 = vector.shape_cast %60 : vector<1x1x32xf32> to vector<1x32xf32>
    %62 = vector.broadcast %61 : vector<1x32xf32> to vector<16x32xf32>
    %63 = arith.addf %58, %62 : vector<16x32xf32>
    %cst_30 = arith.constant 8.000000e+00 : f32
    %64 = math.sqrt %cst_30 : f32
    %cst_31 = arith.constant 1.000000e+00 : f32
    %65 = arith.divf %cst_31, %64 : f32
    %66 = vector.broadcast %65 : f32 to vector<16x32xf32>
    %67 = arith.mulf %45, %66 : vector<16x32xf32>
    %68 = arith.truncf %67 : vector<16x32xf32> to vector<16x32xbf16>
    %69 = arith.truncf %54 : vector<16x32xf32> to vector<16x32xbf16>
    %70 = arith.truncf %63 : vector<16x32xf32> to vector<16x32xbf16>
    %71 = vector.extract_strided_slice %68 {offsets = [0, 0], sizes = [8, 32], strides = [1, 1]} : vector<16x32xbf16> to vector<8x32xbf16>
    %72 = vector.extract_strided_slice %69 {offsets = [0, 0], sizes = [8, 32], strides = [1, 1]} : vector<16x32xbf16> to vector<8x32xbf16>
    %73 = vector.extract_strided_slice %70 {offsets = [0, 0], sizes = [8, 32], strides = [1, 1]} : vector<16x32xbf16> to vector<8x32xbf16>
    %74 = vector.extract_strided_slice %4 {offsets = [0, 0, 0], sizes = [1, 1, 8], strides = [1, 1, 1]} : vector<2x1x8xf32> to vector<1x1x8xf32>
    %75 = vector.shape_cast %74 : vector<1x1x8xf32> to vector<1x8xf32>
    %76 = vector.extract_strided_slice %71 {offsets = [0, 0], sizes = [8, 8], strides = [1, 1]} : vector<8x32xbf16> to vector<8x8xbf16>
    %77 = vector.extract_strided_slice %72 {offsets = [0, 0], sizes = [8, 8], strides = [1, 1]} : vector<8x32xbf16> to vector<8x8xbf16>
    "tpu.trace_start"() <{level = 10 : i32, message = "td,sd->ts"}> : () -> ()
    %cst_32 = arith.constant dense<0.000000e+00> : vector<8x8xf32>
    %78 = tpu.matmul %76, %77, %cst_32 {dimension_numbers = #tpu.dot_dimension_numbers<[1], [1], [0], [0], [0, 0, 1, 0], [], []>} : vector<8x8xbf16>, vector<8x8xbf16>, vector<8x8xf32> -> vector<8x8xf32>
    "tpu.trace_stop"() : () -> ()
    %79 = vector.broadcast %75 : vector<1x8xf32> to vector<8x8xf32>
    %80 = arith.addf %78, %79 : vector<8x8xf32>
    %cst_33 = arith.constant dense<0xFF800000> : vector<8xf32>
    %81 = vector.multi_reduction <maximumf>, %80, %cst_33 [1] : vector<8x8xf32> to vector<8xf32>
    %82 = vector.shape_cast %81 : vector<8xf32> to vector<8x1xf32>
    %83 = vector.broadcast %82 : vector<8x1xf32> to vector<8x8xf32>
    %84 = arith.subf %80, %83 : vector<8x8xf32>
    %85 = math.exp %84 : vector<8x8xf32>
    %cst_34 = arith.constant dense<0.000000e+00> : vector<8xf32>
    %86 = vector.multi_reduction <add>, %85, %cst_34 [1] : vector<8x8xf32> to vector<8xf32>
    %87 = vector.shape_cast %86 : vector<8xf32> to vector<8x1xf32>
    %88 = tpu.reciprocal %87 {approx = true} : vector<8x1xf32> -> vector<8x1xf32>
    %89 = arith.truncf %85 : vector<8x8xf32> to vector<8x8xbf16>
    %90 = vector.extract_strided_slice %73 {offsets = [0, 0], sizes = [8, 8], strides = [1, 1]} : vector<8x32xbf16> to vector<8x8xbf16>
    %cst_35 = arith.constant dense<0.000000e+00> : vector<8x8xf32>
    %91 = tpu.matmul %89, %90, %cst_35 {dimension_numbers = #tpu.dot_dimension_numbers<[1], [0], [0], [1], [0, 0, 1, 1], [], []>} : vector<8x8xbf16>, vector<8x8xbf16>, vector<8x8xf32> -> vector<8x8xf32>
    %92 = vector.broadcast %88 : vector<8x1xf32> to vector<8x8xf32>
    %93 = arith.mulf %91, %92 : vector<8x8xf32>
    %c0_36 = arith.constant 0 : index
    %c0_37 = arith.constant 0 : index
    %94 = vector.load %arg24[%c0_36, %c0_37] : memref<16x32xf32, #tpu.memory_space<vmem>>, vector<8x8xf32>
    tpu.vector_store %arg24[%c0_36, %c0_37], %93 {strides = array<i32>} : memref<16x32xf32, #tpu.memory_space<vmem>>, vector<8x8xf32>,
    %95 = vector.extract_strided_slice %71 {offsets = [0, 8], sizes = [8, 8], strides = [1, 1]} : vector<8x32xbf16> to vector<8x8xbf16>
    %96 = vector.extract_strided_slice %72 {offsets = [0, 8], sizes = [8, 8], strides = [1, 1]} : vector<8x32xbf16> to vector<8x8xbf16>
    "tpu.trace_start"() <{level = 10 : i32, message = "td,sd->ts"}> : () -> ()
    %cst_38 = arith.constant dense<0.000000e+00> : vector<8x8xf32>
    %97 = tpu.matmul %95, %96, %cst_38 {dimension_numbers = #tpu.dot_dimension_numbers<[1], [1], [0], [0], [0, 0, 1, 0], [], []>} : vector<8x8xbf16>, vector<8x8xbf16>, vector<8x8xf32> -> vector<8x8xf32>
    "tpu.trace_stop"() : () -> ()
    %98 = vector.broadcast %75 : vector<1x8xf32> to vector<8x8xf32>
    %99 = arith.addf %97, %98 : vector<8x8xf32>
    %cst_39 = arith.constant dense<0xFF800000> : vector<8xf32>
    %100 = vector.multi_reduction <maximumf>, %99, %cst_39 [1] : vector<8x8xf32> to vector<8xf32>
    %101 = vector.shape_cast %100 : vector<8xf32> to vector<8x1xf32>
    %102 = vector.broadcast %101 : vector<8x1xf32> to vector<8x8xf32>
    %103 = arith.subf %99, %102 : vector<8x8xf32>
    %104 = math.exp %103 : vector<8x8xf32>
    %cst_40 = arith.constant dense<0.000000e+00> : vector<8xf32>
    %105 = vector.multi_reduction <add>, %104, %cst_40 [1] : vector<8x8xf32> to vector<8xf32>
    %106 = vector.shape_cast %105 : vector<8xf32> to vector<8x1xf32>
    %107 = tpu.reciprocal %106 {approx = true} : vector<8x1xf32> -> vector<8x1xf32>
    %108 = arith.truncf %104 : vector<8x8xf32> to vector<8x8xbf16>
    %109 = vector.extract_strided_slice %73 {offsets = [0, 8], sizes = [8, 8], strides = [1, 1]} : vector<8x32xbf16> to vector<8x8xbf16>
    %cst_41 = arith.constant dense<0.000000e+00> : vector<8x8xf32>
    %110 = tpu.matmul %108, %109, %cst_41 {dimension_numbers = #tpu.dot_dimension_numbers<[1], [0], [0], [1], [0, 0, 1, 1], [], []>} : vector<8x8xbf16>, vector<8x8xbf16>, vector<8x8xf32> -> vector<8x8xf32>
    %111 = vector.broadcast %107 : vector<8x1xf32> to vector<8x8xf32>
    %112 = arith.mulf %110, %111 : vector<8x8xf32>
    %c0_42 = arith.constant 0 : index
    %c8 = arith.constant 8 : index
    %113 = vector.load %arg24[%c0_42, %c8] : memref<16x32xf32, #tpu.memory_space<vmem>>, vector<8x8xf32>
    tpu.vector_store %arg24[%c0_42, %c8], %112 {strides = array<i32>} : memref<16x32xf32, #tpu.memory_space<vmem>>, vector<8x8xf32>,
    %114 = vector.extract_strided_slice %71 {offsets = [0, 16], sizes = [8, 8], strides = [1, 1]} : vector<8x32xbf16> to vector<8x8xbf16>
    %115 = vector.extract_strided_slice %72 {offsets = [0, 16], sizes = [8, 8], strides = [1, 1]} : vector<8x32xbf16> to vector<8x8xbf16>
    "tpu.trace_start"() <{level = 10 : i32, message = "td,sd->ts"}> : () -> ()
    %cst_43 = arith.constant dense<0.000000e+00> : vector<8x8xf32>
    %116 = tpu.matmul %114, %115, %cst_43 {dimension_numbers = #tpu.dot_dimension_numbers<[1], [1], [0], [0], [0, 0, 1, 0], [], []>} : vector<8x8xbf16>, vector<8x8xbf16>, vector<8x8xf32> -> vector<8x8xf32>
    "tpu.trace_stop"() : () -> ()
    %117 = vector.broadcast %75 : vector<1x8xf32> to vector<8x8xf32>
    %118 = arith.addf %116, %117 : vector<8x8xf32>
    %cst_44 = arith.constant dense<0xFF800000> : vector<8xf32>
    %119 = vector.multi_reduction <maximumf>, %118, %cst_44 [1] : vector<8x8xf32> to vector<8xf32>
    %120 = vector.shape_cast %119 : vector<8xf32> to vector<8x1xf32>
    %121 = vector.broadcast %120 : vector<8x1xf32> to vector<8x8xf32>
    %122 = arith.subf %118, %121 : vector<8x8xf32>
    %123 = math.exp %122 : vector<8x8xf32>
    %cst_45 = arith.constant dense<0.000000e+00> : vector<8xf32>
    %124 = vector.multi_reduction <add>, %123, %cst_45 [1] : vector<8x8xf32> to vector<8xf32>
    %125 = vector.shape_cast %124 : vector<8xf32> to vector<8x1xf32>
    %126 = tpu.reciprocal %125 {approx = true} : vector<8x1xf32> -> vector<8x1xf32>
    %127 = arith.truncf %123 : vector<8x8xf32> to vector<8x8xbf16>
    %128 = vector.extract_strided_slice %73 {offsets = [0, 16], sizes = [8, 8], strides = [1, 1]} : vector<8x32xbf16> to vector<8x8xbf16>
    %cst_46 = arith.constant dense<0.000000e+00> : vector<8x8xf32>
    %129 = tpu.matmul %127, %128, %cst_46 {dimension_numbers = #tpu.dot_dimension_numbers<[1], [0], [0], [1], [0, 0, 1, 1], [], []>} : vector<8x8xbf16>, vector<8x8xbf16>, vector<8x8xf32> -> vector<8x8xf32>
    %130 = vector.broadcast %126 : vector<8x1xf32> to vector<8x8xf32>
    %131 = arith.mulf %129, %130 : vector<8x8xf32>
    %c0_47 = arith.constant 0 : index
    %c16 = arith.constant 16 : index
    %132 = vector.load %arg24[%c0_47, %c16] : memref<16x32xf32, #tpu.memory_space<vmem>>, vector<8x8xf32>
    tpu.vector_store %arg24[%c0_47, %c16], %131 {strides = array<i32>} : memref<16x32xf32, #tpu.memory_space<vmem>>, vector<8x8xf32>,
    %133 = vector.extract_strided_slice %71 {offsets = [0, 24], sizes = [8, 8], strides = [1, 1]} : vector<8x32xbf16> to vector<8x8xbf16>
    %134 = vector.extract_strided_slice %72 {offsets = [0, 24], sizes = [8, 8], strides = [1, 1]} : vector<8x32xbf16> to vector<8x8xbf16>
    "tpu.trace_start"() <{level = 10 : i32, message = "td,sd->ts"}> : () -> ()
    %cst_48 = arith.constant dense<0.000000e+00> : vector<8x8xf32>
    %135 = tpu.matmul %133, %134, %cst_48 {dimension_numbers = #tpu.dot_dimension_numbers<[1], [1], [0], [0], [0, 0, 1, 0], [], []>} : vector<8x8xbf16>, vector<8x8xbf16>, vector<8x8xf32> -> vector<8x8xf32>
    "tpu.trace_stop"() : () -> ()
    %136 = vector.broadcast %75 : vector<1x8xf32> to vector<8x8xf32>
    %137 = arith.addf %135, %136 : vector<8x8xf32>
    %cst_49 = arith.constant dense<0xFF800000> : vector<8xf32>
    %138 = vector.multi_reduction <maximumf>, %137, %cst_49 [1] : vector<8x8xf32> to vector<8xf32>
    %139 = vector.shape_cast %138 : vector<8xf32> to vector<8x1xf32>
    %140 = vector.broadcast %139 : vector<8x1xf32> to vector<8x8xf32>
    %141 = arith.subf %137, %140 : vector<8x8xf32>
    %142 = math.exp %141 : vector<8x8xf32>
    %cst_50 = arith.constant dense<0.000000e+00> : vector<8xf32>
    %143 = vector.multi_reduction <add>, %142, %cst_50 [1] : vector<8x8xf32> to vector<8xf32>
    %144 = vector.shape_cast %143 : vector<8xf32> to vector<8x1xf32>
    %145 = tpu.reciprocal %144 {approx = true} : vector<8x1xf32> -> vector<8x1xf32>
    %146 = arith.truncf %142 : vector<8x8xf32> to vector<8x8xbf16>
    %147 = vector.extract_strided_slice %73 {offsets = [0, 24], sizes = [8, 8], strides = [1, 1]} : vector<8x32xbf16> to vector<8x8xbf16>
    %cst_51 = arith.constant dense<0.000000e+00> : vector<8x8xf32>
    %148 = tpu.matmul %146, %147, %cst_51 {dimension_numbers = #tpu.dot_dimension_numbers<[1], [0], [0], [1], [0, 0, 1, 1], [], []>} : vector<8x8xbf16>, vector<8x8xbf16>, vector<8x8xf32> -> vector<8x8xf32>
    %149 = vector.broadcast %145 : vector<8x1xf32> to vector<8x8xf32>
    %150 = arith.mulf %148, %149 : vector<8x8xf32>
    %c0_52 = arith.constant 0 : index
    %c24 = arith.constant 24 : index
    %151 = vector.load %arg24[%c0_52, %c24] : memref<16x32xf32, #tpu.memory_space<vmem>>, vector<8x8xf32>
    tpu.vector_store %arg24[%c0_52, %c24], %150 {strides = array<i32>} : memref<16x32xf32, #tpu.memory_space<vmem>>, vector<8x8xf32>,
    %152 = vector.extract_strided_slice %68 {offsets = [8, 0], sizes = [8, 32], strides = [1, 1]} : vector<16x32xbf16> to vector<8x32xbf16>
    %153 = vector.extract_strided_slice %69 {offsets = [8, 0], sizes = [8, 32], strides = [1, 1]} : vector<16x32xbf16> to vector<8x32xbf16>
    %154 = vector.extract_strided_slice %70 {offsets = [8, 0], sizes = [8, 32], strides = [1, 1]} : vector<16x32xbf16> to vector<8x32xbf16>
    %155 = vector.extract_strided_slice %4 {offsets = [1, 0, 0], sizes = [1, 1, 8], strides = [1, 1, 1]} : vector<2x1x8xf32> to vector<1x1x8xf32>
    %156 = vector.shape_cast %155 : vector<1x1x8xf32> to vector<1x8xf32>
    %157 = vector.extract_strided_slice %152 {offsets = [0, 0], sizes = [8, 8], strides = [1, 1]} : vector<8x32xbf16> to vector<8x8xbf16>
    %158 = vector.extract_strided_slice %153 {offsets = [0, 0], sizes = [8, 8], strides = [1, 1]} : vector<8x32xbf16> to vector<8x8xbf16>
    "tpu.trace_start"() <{level = 10 : i32, message = "td,sd->ts"}> : () -> ()
    %cst_53 = arith.constant dense<0.000000e+00> : vector<8x8xf32>
    %159 = tpu.matmul %157, %158, %cst_53 {dimension_numbers = #tpu.dot_dimension_numbers<[1], [1], [0], [0], [0, 0, 1, 0], [], []>} : vector<8x8xbf16>, vector<8x8xbf16>, vector<8x8xf32> -> vector<8x8xf32>
    "tpu.trace_stop"() : () -> ()
    %160 = vector.broadcast %156 : vector<1x8xf32> to vector<8x8xf32>
    %161 = arith.addf %159, %160 : vector<8x8xf32>
    %cst_54 = arith.constant dense<0xFF800000> : vector<8xf32>
    %162 = vector.multi_reduction <maximumf>, %161, %cst_54 [1] : vector<8x8xf32> to vector<8xf32>
    %163 = vector.shape_cast %162 : vector<8xf32> to vector<8x1xf32>
    %164 = vector.broadcast %163 : vector<8x1xf32> to vector<8x8xf32>
    %165 = arith.subf %161, %164 : vector<8x8xf32>
    %166 = math.exp %165 : vector<8x8xf32>
    %cst_55 = arith.constant dense<0.000000e+00> : vector<8xf32>
    %167 = vector.multi_reduction <add>, %166, %cst_55 [1] : vector<8x8xf32> to vector<8xf32>
    %168 = vector.shape_cast %167 : vector<8xf32> to vector<8x1xf32>
    %169 = tpu.reciprocal %168 {approx = true} : vector<8x1xf32> -> vector<8x1xf32>
    %170 = arith.truncf %166 : vector<8x8xf32> to vector<8x8xbf16>
    %171 = vector.extract_strided_slice %154 {offsets = [0, 0], sizes = [8, 8], strides = [1, 1]} : vector<8x32xbf16> to vector<8x8xbf16>
    %cst_56 = arith.constant dense<0.000000e+00> : vector<8x8xf32>
    %172 = tpu.matmul %170, %171, %cst_56 {dimension_numbers = #tpu.dot_dimension_numbers<[1], [0], [0], [1], [0, 0, 1, 1], [], []>} : vector<8x8xbf16>, vector<8x8xbf16>, vector<8x8xf32> -> vector<8x8xf32>
    %173 = vector.broadcast %169 : vector<8x1xf32> to vector<8x8xf32>
    %174 = arith.mulf %172, %173 : vector<8x8xf32>
    %c8_57 = arith.constant 8 : index
    %c0_58 = arith.constant 0 : index
    %175 = vector.load %arg24[%c8_57, %c0_58] : memref<16x32xf32, #tpu.memory_space<vmem>>, vector<8x8xf32>
    tpu.vector_store %arg24[%c8_57, %c0_58], %174 {strides = array<i32>} : memref<16x32xf32, #tpu.memory_space<vmem>>, vector<8x8xf32>,
    %176 = vector.extract_strided_slice %152 {offsets = [0, 8], sizes = [8, 8], strides = [1, 1]} : vector<8x32xbf16> to vector<8x8xbf16>
    %177 = vector.extract_strided_slice %153 {offsets = [0, 8], sizes = [8, 8], strides = [1, 1]} : vector<8x32xbf16> to vector<8x8xbf16>
    "tpu.trace_start"() <{level = 10 : i32, message = "td,sd->ts"}> : () -> ()
    %cst_59 = arith.constant dense<0.000000e+00> : vector<8x8xf32>
    %178 = tpu.matmul %176, %177, %cst_59 {dimension_numbers = #tpu.dot_dimension_numbers<[1], [1], [0], [0], [0, 0, 1, 0], [], []>} : vector<8x8xbf16>, vector<8x8xbf16>, vector<8x8xf32> -> vector<8x8xf32>
    "tpu.trace_stop"() : () -> ()
    %179 = vector.broadcast %156 : vector<1x8xf32> to vector<8x8xf32>
    %180 = arith.addf %178, %179 : vector<8x8xf32>
    %cst_60 = arith.constant dense<0xFF800000> : vector<8xf32>
    %181 = vector.multi_reduction <maximumf>, %180, %cst_60 [1] : vector<8x8xf32> to vector<8xf32>
    %182 = vector.shape_cast %181 : vector<8xf32> to vector<8x1xf32>
    %183 = vector.broadcast %182 : vector<8x1xf32> to vector<8x8xf32>
    %184 = arith.subf %180, %183 : vector<8x8xf32>
    %185 = math.exp %184 : vector<8x8xf32>
    %cst_61 = arith.constant dense<0.000000e+00> : vector<8xf32>
    %186 = vector.multi_reduction <add>, %185, %cst_61 [1] : vector<8x8xf32> to vector<8xf32>
    %187 = vector.shape_cast %186 : vector<8xf32> to vector<8x1xf32>
    %188 = tpu.reciprocal %187 {approx = true} : vector<8x1xf32> -> vector<8x1xf32>
    %189 = arith.truncf %185 : vector<8x8xf32> to vector<8x8xbf16>
    %190 = vector.extract_strided_slice %154 {offsets = [0, 8], sizes = [8, 8], strides = [1, 1]} : vector<8x32xbf16> to vector<8x8xbf16>
    %cst_62 = arith.constant dense<0.000000e+00> : vector<8x8xf32>
    %191 = tpu.matmul %189, %190, %cst_62 {dimension_numbers = #tpu.dot_dimension_numbers<[1], [0], [0], [1], [0, 0, 1, 1], [], []>} : vector<8x8xbf16>, vector<8x8xbf16>, vector<8x8xf32> -> vector<8x8xf32>
    %192 = vector.broadcast %188 : vector<8x1xf32> to vector<8x8xf32>
    %193 = arith.mulf %191, %192 : vector<8x8xf32>
    %c8_63 = arith.constant 8 : index
    %c8_64 = arith.constant 8 : index
    %194 = vector.load %arg24[%c8_63, %c8_64] : memref<16x32xf32, #tpu.memory_space<vmem>>, vector<8x8xf32>
    tpu.vector_store %arg24[%c8_63, %c8_64], %193 {strides = array<i32>} : memref<16x32xf32, #tpu.memory_space<vmem>>, vector<8x8xf32>,
    %195 = vector.extract_strided_slice %152 {offsets = [0, 16], sizes = [8, 8], strides = [1, 1]} : vector<8x32xbf16> to vector<8x8xbf16>
    %196 = vector.extract_strided_slice %153 {offsets = [0, 16], sizes = [8, 8], strides = [1, 1]} : vector<8x32xbf16> to vector<8x8xbf16>
    "tpu.trace_start"() <{level = 10 : i32, message = "td,sd->ts"}> : () -> ()
    %cst_65 = arith.constant dense<0.000000e+00> : vector<8x8xf32>
    %197 = tpu.matmul %195, %196, %cst_65 {dimension_numbers = #tpu.dot_dimension_numbers<[1], [1], [0], [0], [0, 0, 1, 0], [], []>} : vector<8x8xbf16>, vector<8x8xbf16>, vector<8x8xf32> -> vector<8x8xf32>
    "tpu.trace_stop"() : () -> ()
    %198 = vector.broadcast %156 : vector<1x8xf32> to vector<8x8xf32>
    %199 = arith.addf %197, %198 : vector<8x8xf32>
    %cst_66 = arith.constant dense<0xFF800000> : vector<8xf32>
    %200 = vector.multi_reduction <maximumf>, %199, %cst_66 [1] : vector<8x8xf32> to vector<8xf32>
    %201 = vector.shape_cast %200 : vector<8xf32> to vector<8x1xf32>
    %202 = vector.broadcast %201 : vector<8x1xf32> to vector<8x8xf32>
    %203 = arith.subf %199, %202 : vector<8x8xf32>
    %204 = math.exp %203 : vector<8x8xf32>
    %cst_67 = arith.constant dense<0.000000e+00> : vector<8xf32>
    %205 = vector.multi_reduction <add>, %204, %cst_67 [1] : vector<8x8xf32> to vector<8xf32>
    %206 = vector.shape_cast %205 : vector<8xf32> to vector<8x1xf32>
    %207 = tpu.reciprocal %206 {approx = true} : vector<8x1xf32> -> vector<8x1xf32>
    %208 = arith.truncf %204 : vector<8x8xf32> to vector<8x8xbf16>
    %209 = vector.extract_strided_slice %154 {offsets = [0, 16], sizes = [8, 8], strides = [1, 1]} : vector<8x32xbf16> to vector<8x8xbf16>
    %cst_68 = arith.constant dense<0.000000e+00> : vector<8x8xf32>
    %210 = tpu.matmul %208, %209, %cst_68 {dimension_numbers = #tpu.dot_dimension_numbers<[1], [0], [0], [1], [0, 0, 1, 1], [], []>} : vector<8x8xbf16>, vector<8x8xbf16>, vector<8x8xf32> -> vector<8x8xf32>
    %211 = vector.broadcast %207 : vector<8x1xf32> to vector<8x8xf32>
    %212 = arith.mulf %210, %211 : vector<8x8xf32>
    %c8_69 = arith.constant 8 : index
    %c16_70 = arith.constant 16 : index
    %213 = vector.load %arg24[%c8_69, %c16_70] : memref<16x32xf32, #tpu.memory_space<vmem>>, vector<8x8xf32>
    tpu.vector_store %arg24[%c8_69, %c16_70], %212 {strides = array<i32>} : memref<16x32xf32, #tpu.memory_space<vmem>>, vector<8x8xf32>,
    %214 = vector.extract_strided_slice %152 {offsets = [0, 24], sizes = [8, 8], strides = [1, 1]} : vector<8x32xbf16> to vector<8x8xbf16>
    %215 = vector.extract_strided_slice %153 {offsets = [0, 24], sizes = [8, 8], strides = [1, 1]} : vector<8x32xbf16> to vector<8x8xbf16>
    "tpu.trace_start"() <{level = 10 : i32, message = "td,sd->ts"}> : () -> ()
    %cst_71 = arith.constant dense<0.000000e+00> : vector<8x8xf32>
    %216 = tpu.matmul %214, %215, %cst_71 {dimension_numbers = #tpu.dot_dimension_numbers<[1], [1], [0], [0], [0, 0, 1, 0], [], []>} : vector<8x8xbf16>, vector<8x8xbf16>, vector<8x8xf32> -> vector<8x8xf32>
    "tpu.trace_stop"() : () -> ()
    %217 = vector.broadcast %156 : vector<1x8xf32> to vector<8x8xf32>
    %218 = arith.addf %216, %217 : vector<8x8xf32>
    %cst_72 = arith.constant dense<0xFF800000> : vector<8xf32>
    %219 = vector.multi_reduction <maximumf>, %218, %cst_72 [1] : vector<8x8xf32> to vector<8xf32>
    %220 = vector.shape_cast %219 : vector<8xf32> to vector<8x1xf32>
    %221 = vector.broadcast %220 : vector<8x1xf32> to vector<8x8xf32>
    %222 = arith.subf %218, %221 : vector<8x8xf32>
    %223 = math.exp %222 : vector<8x8xf32>
    %cst_73 = arith.constant dense<0.000000e+00> : vector<8xf32>
    %224 = vector.multi_reduction <add>, %223, %cst_73 [1] : vector<8x8xf32> to vector<8xf32>
    %225 = vector.shape_cast %224 : vector<8xf32> to vector<8x1xf32>
    %226 = tpu.reciprocal %225 {approx = true} : vector<8x1xf32> -> vector<8x1xf32>
    %227 = arith.truncf %223 : vector<8x8xf32> to vector<8x8xbf16>
    %228 = vector.extract_strided_slice %154 {offsets = [0, 24], sizes = [8, 8], strides = [1, 1]} : vector<8x32xbf16> to vector<8x8xbf16>
    %cst_74 = arith.constant dense<0.000000e+00> : vector<8x8xf32>
    %229 = tpu.matmul %227, %228, %cst_74 {dimension_numbers = #tpu.dot_dimension_numbers<[1], [0], [0], [1], [0, 0, 1, 1], [], []>} : vector<8x8xbf16>, vector<8x8xbf16>, vector<8x8xf32> -> vector<8x8xf32>
    %230 = vector.broadcast %226 : vector<8x1xf32> to vector<8x8xf32>
    %231 = arith.mulf %229, %230 : vector<8x8xf32>
    %c8_75 = arith.constant 8 : index
    %c24_76 = arith.constant 24 : index
    %232 = vector.load %arg24[%c8_75, %c24_76] : memref<16x32xf32, #tpu.memory_space<vmem>>, vector<8x8xf32>
    tpu.vector_store %arg24[%c8_75, %c24_76], %231 {strides = array<i32>} : memref<16x32xf32, #tpu.memory_space<vmem>>, vector<8x8xf32>,
    %c0_77 = arith.constant 0 : index
    %c0_78 = arith.constant 0 : index
    %233 = vector.load %arg24[%c0_77, %c0_78] : memref<16x32xf32, #tpu.memory_space<vmem>>, vector<16x32xf32>
    %234 = arith.truncf %233 : vector<16x32xf32> to vector<16x32xbf16>
    %cst_79 = arith.constant dense<0.000000e+00> : vector<16x32xf32>
    %235 = tpu.matmul %234, %36, %cst_79 {dimension_numbers = #tpu.dot_dimension_numbers<[1], [0], [0], [1], [0, 0, 1, 1], [], []>} : vector<16x32xbf16>, vector<32x32xbf16>, vector<16x32xf32> -> vector<16x32xf32>
    %236 = arith.index_cast %arg1 : i32 to index
    %c0_80 = arith.constant 0 : index
    %c0_81 = arith.constant 0 : index
    %237 = vector.load %arg13[%236, %c0_80, %c0_81] : memref<2x1x32xf32, #tpu.memory_space<vmem>>, vector<1x1x32xf32>
    %238 = vector.shape_cast %237 : vector<1x1x32xf32> to vector<1x32xf32>
    %239 = vector.broadcast %238 : vector<1x32xf32> to vector<16x32xf32>
    %240 = arith.addf %235, %239 : vector<16x32xf32>
    %241 = arith.addf %3, %240 : vector<16x32xf32>
    %242 = arith.index_cast %arg1 : i32 to index
    %c0_82 = arith.constant 0 : index
    %c0_83 = arith.constant 0 : index
    %243 = vector.load %arg14[%242, %c0_82, %c0_83] : memref<2x1x32xf32, #tpu.memory_space<vmem>>, vector<1x1x32xf32>
    %244 = vector.shape_cast %243 : vector<1x1x32xf32> to vector<1x32xf32>
    %245 = arith.index_cast %arg1 : i32 to index
    %c0_84 = arith.constant 0 : index
    %c0_85 = arith.constant 0 : index
    %246 = vector.load %arg15[%245, %c0_84, %c0_85] : memref<2x1x32xf32, #tpu.memory_space<vmem>>, vector<1x1x32xf32>
    %247 = vector.shape_cast %246 : vector<1x1x32xf32> to vector<1x32xf32>
    %cst_86 = arith.constant dense<0.000000e+00> : vector<16xf32>
    %248 = vector.multi_reduction <add>, %241, %cst_86 [1] : vector<16x32xf32> to vector<16xf32>
    %249 = vector.shape_cast %248 : vector<16xf32> to vector<16x1xf32>
    %cst_87 = arith.constant 3.200000e+01 : f32
    %250 = vector.broadcast %cst_87 : f32 to vector<16x1xf32>
    %251 = arith.divf %249, %250 : vector<16x1xf32>
    %252 = vector.broadcast %251 : vector<16x1xf32> to vector<16x32xf32>
    %253 = arith.subf %241, %252 : vector<16x32xf32>
    %254 = arith.mulf %253, %253 : vector<16x32xf32>
    %cst_88 = arith.constant dense<0.000000e+00> : vector<16xf32>
    %255 = vector.multi_reduction <add>, %254, %cst_88 [1] : vector<16x32xf32> to vector<16xf32>
    %256 = vector.shape_cast %255 : vector<16xf32> to vector<16x1xf32>
    %cst_89 = arith.constant 3.200000e+01 : f32
    %257 = vector.broadcast %cst_89 : f32 to vector<16x1xf32>
    %258 = arith.divf %256, %257 : vector<16x1xf32>
    %259 = vector.broadcast %251 : vector<16x1xf32> to vector<16x32xf32>
    %260 = arith.subf %241, %259 : vector<16x32xf32>
    %cst_90 = arith.constant 9.99999997E-7 : f32
    %261 = vector.broadcast %cst_90 : f32 to vector<16x1xf32>
    %262 = arith.addf %258, %261 : vector<16x1xf32>
    %263 = math.rsqrt %262 : vector<16x1xf32>
    %264 = vector.broadcast %263 : vector<16x1xf32> to vector<16x32xf32>
    %265 = arith.mulf %260, %264 : vector<16x32xf32>
    %266 = vector.broadcast %244 : vector<1x32xf32> to vector<16x32xf32>
    %267 = arith.mulf %265, %266 : vector<16x32xf32>
    %268 = vector.broadcast %247 : vector<1x32xf32> to vector<16x32xf32>
    %269 = arith.addf %267, %268 : vector<16x32xf32>
    %270 = arith.truncf %269 : vector<16x32xf32> to vector<16x32xbf16>
    %271 = arith.index_cast %arg1 : i32 to index
    %c0_91 = arith.constant 0 : index
    %c0_92 = arith.constant 0 : index
    %272 = vector.load %arg16[%271, %c0_91, %c0_92] : memref<2x32x64xbf16, #tpu.memory_space<vmem>>, vector<1x32x64xbf16>
    %273 = vector.shape_cast %272 : vector<1x32x64xbf16> to vector<32x64xbf16>
    %cst_93 = arith.constant dense<0.000000e+00> : vector<16x64xf32>
    %274 = tpu.matmul %270, %273, %cst_93 {dimension_numbers = #tpu.dot_dimension_numbers<[1], [0], [0], [1], [0, 0, 1, 1], [], []>} : vector<16x32xbf16>, vector<32x64xbf16>, vector<16x64xf32> -> vector<16x64xf32>
    %275 = arith.index_cast %arg1 : i32 to index
    %c0_94 = arith.constant 0 : index
    %c0_95 = arith.constant 0 : index
    %276 = vector.load %arg17[%275, %c0_94, %c0_95] : memref<2x1x64xf32, #tpu.memory_space<vmem>>, vector<1x1x64xf32>
    %277 = vector.shape_cast %276 : vector<1x1x64xf32> to vector<1x64xf32>
    %278 = vector.broadcast %277 : vector<1x64xf32> to vector<16x64xf32>
    %279 = arith.addf %274, %278 : vector<16x64xf32>
    %cst_96 = arith.constant 0.000000e+00 : f32
    %280 = vector.broadcast %cst_96 : f32 to vector<16x64xf32>
    %281 = arith.maximumf %279, %280 : vector<16x64xf32>
    %282 = arith.truncf %281 : vector<16x64xf32> to vector<16x64xbf16>
    %283 = arith.index_cast %arg1 : i32 to index
    %c0_97 = arith.constant 0 : index
    %c0_98 = arith.constant 0 : index
    %284 = vector.load %arg18[%283, %c0_97, %c0_98] : memref<2x64x32xbf16, #tpu.memory_space<vmem>>, vector<1x64x32xbf16>
    %285 = vector.shape_cast %284 : vector<1x64x32xbf16> to vector<64x32xbf16>
    %cst_99 = arith.constant dense<0.000000e+00> : vector<16x32xf32>
    %286 = tpu.matmul %282, %285, %cst_99 {dimension_numbers = #tpu.dot_dimension_numbers<[1], [0], [0], [1], [0, 0, 1, 1], [], []>} : vector<16x64xbf16>, vector<64x32xbf16>, vector<16x32xf32> -> vector<16x32xf32>
    %287 = arith.index_cast %arg1 : i32 to index
    %c0_100 = arith.constant 0 : index
    %c0_101 = arith.constant 0 : index
    %288 = vector.load %arg19[%287, %c0_100, %c0_101] : memref<2x1x32xf32, #tpu.memory_space<vmem>>, vector<1x1x32xf32>
    %289 = vector.shape_cast %288 : vector<1x1x32xf32> to vector<1x32xf32>
    %290 = vector.broadcast %289 : vector<1x32xf32> to vector<16x32xf32>
    %291 = arith.addf %286, %290 : vector<16x32xf32>
    %292 = arith.addf %241, %291 : vector<16x32xf32>
    %c0_102 = arith.constant 0 : index
    %c0_103 = arith.constant 0 : index
    %293 = vector.load %arg23[%c0_102, %c0_103] : memref<16x32xf32, #tpu.memory_space<vmem>>, vector<16x32xf32>
    tpu.vector_store %arg23[%c0_102, %c0_103], %292 {strides = array<i32>} : memref<16x32xf32, #tpu.memory_space<vmem>>, vector<16x32xf32>,
    %c1_i32 = arith.constant 1 : i32
    %294 = arith.cmpi eq, %arg1, %c1_i32 : i32
    %295 = arith.extui %294 : i1 to i32
    %c0_i32_104 = arith.constant 0 : i32
    %296 = arith.cmpi ne, %295, %c0_i32_104 : i32
    scf.if %296 {
      %c0_105 = arith.constant 0 : index
      %c0_106 = arith.constant 0 : index
      %297 = vector.load %arg20[%c0_105, %c0_106] : memref<1x32xf32, #tpu.memory_space<vmem>>, vector<1x32xf32>
      %c0_107 = arith.constant 0 : index
      %c0_108 = arith.constant 0 : index
      %298 = vector.load %arg21[%c0_107, %c0_108] : memref<1x32xf32, #tpu.memory_space<vmem>>, vector<1x32xf32>
      %cst_109 = arith.constant dense<0.000000e+00> : vector<16xf32>
      %299 = vector.multi_reduction <add>, %292, %cst_109 [1] : vector<16x32xf32> to vector<16xf32>
      %300 = vector.shape_cast %299 : vector<16xf32> to vector<16x1xf32>
      %cst_110 = arith.constant 3.200000e+01 : f32
      %301 = vector.broadcast %cst_110 : f32 to vector<16x1xf32>
      %302 = arith.divf %300, %301 : vector<16x1xf32>
      %303 = vector.broadcast %302 : vector<16x1xf32> to vector<16x32xf32>
      %304 = arith.subf %292, %303 : vector<16x32xf32>
      %305 = arith.mulf %304, %304 : vector<16x32xf32>
      %cst_111 = arith.constant dense<0.000000e+00> : vector<16xf32>
      %306 = vector.multi_reduction <add>, %305, %cst_111 [1] : vector<16x32xf32> to vector<16xf32>
      %307 = vector.shape_cast %306 : vector<16xf32> to vector<16x1xf32>
      %cst_112 = arith.constant 3.200000e+01 : f32
      %308 = vector.broadcast %cst_112 : f32 to vector<16x1xf32>
      %309 = arith.divf %307, %308 : vector<16x1xf32>
      %310 = vector.broadcast %302 : vector<16x1xf32> to vector<16x32xf32>
      %311 = arith.subf %292, %310 : vector<16x32xf32>
      %cst_113 = arith.constant 9.99999997E-7 : f32
      %312 = vector.broadcast %cst_113 : f32 to vector<16x1xf32>
      %313 = arith.addf %309, %312 : vector<16x1xf32>
      %314 = math.rsqrt %313 : vector<16x1xf32>
      %315 = vector.broadcast %314 : vector<16x1xf32> to vector<16x32xf32>
      %316 = arith.mulf %311, %315 : vector<16x32xf32>
      %317 = vector.broadcast %297 : vector<1x32xf32> to vector<16x32xf32>
      %318 = arith.mulf %316, %317 : vector<16x32xf32>
      %319 = vector.broadcast %298 : vector<1x32xf32> to vector<16x32xf32>
      %320 = arith.addf %318, %319 : vector<16x32xf32>
      %321 = vector.shape_cast %320 : vector<16x32xf32> to vector<2x8x32xf32>
      %c0_114 = arith.constant 0 : index
      %c0_115 = arith.constant 0 : index
      %c0_116 = arith.constant 0 : index
      %322 = vector.load %arg22[%c0_114, %c0_115, %c0_116] : memref<2x8x32xf32, #tpu.memory_space<vmem>>, vector<2x8x32xf32>
      tpu.vector_store %arg22[%c0_114, %c0_115, %c0_116], %321 {strides = array<i32>} : memref<2x8x32xf32, #tpu.memory_space<vmem>>, vector<2x8x32xf32>,
    } else {
    }
    return
  }
  func.func @transform_0(%arg0: i32, %arg1: i32) -> (i32, i32, i32) {
    %c0_i32 = arith.constant 0 : i32
    %c0_i32_0 = arith.constant 0 : i32
    %c0_i32_1 = arith.constant 0 : i32
    return %arg0, %c0_i32, %c0_i32_0 : i32, i32, i32
  }
  func.func @transform_1(%arg0: i32, %arg1: i32) -> (i32, i32, i32) {
    %c0_i32 = arith.constant 0 : i32
    %c0_i32_0 = arith.constant 0 : i32
    %c0_i32_1 = arith.constant 0 : i32
    return %arg0, %c0_i32, %c0_i32_0 : i32, i32, i32
  }
  func.func @transform_2(%arg0: i32, %arg1: i32) -> (i32, i32, i32) {
    %c0_i32 = arith.constant 0 : i32
    %c0_i32_0 = arith.constant 0 : i32
    %c0_i32_1 = arith.constant 0 : i32
    %c0_i32_2 = arith.constant 0 : i32
    return %c0_i32, %c0_i32_0, %c0_i32_1 : i32, i32, i32
  }
  func.func @transform_3(%arg0: i32, %arg1: i32) -> (i32, i32, i32) {
    %c0_i32 = arith.constant 0 : i32
    %c0_i32_0 = arith.constant 0 : i32
    %c0_i32_1 = arith.constant 0 : i32
    %c0_i32_2 = arith.constant 0 : i32
    return %c0_i32, %c0_i32_0, %c0_i32_1 : i32, i32, i32
  }
  func.func @transform_4(%arg0: i32, %arg1: i32) -> (i32, i32, i32) {
    %c0_i32 = arith.constant 0 : i32
    %c0_i32_0 = arith.constant 0 : i32
    %c0_i32_1 = arith.constant 0 : i32
    %c0_i32_2 = arith.constant 0 : i32
    return %c0_i32, %c0_i32_0, %c0_i32_1 : i32, i32, i32
  }
  func.func @transform_5(%arg0: i32, %arg1: i32) -> (i32, i32, i32) {
    %c0_i32 = arith.constant 0 : i32
    %c0_i32_0 = arith.constant 0 : i32
    %c0_i32_1 = arith.constant 0 : i32
    %c0_i32_2 = arith.constant 0 : i32
    return %c0_i32, %c0_i32_0, %c0_i32_1 : i32, i32, i32
  }
  func.func @transform_6(%arg0: i32, %arg1: i32) -> (i32, i32, i32) {
    %c0_i32 = arith.constant 0 : i32
    %c0_i32_0 = arith.constant 0 : i32
    %c0_i32_1 = arith.constant 0 : i32
    %c0_i32_2 = arith.constant 0 : i32
    return %c0_i32, %c0_i32_0, %c0_i32_1 : i32, i32, i32
  }
  func.func @transform_7(%arg0: i32, %arg1: i32) -> (i32, i32, i32) {
    %c0_i32 = arith.constant 0 : i32
    %c0_i32_0 = arith.constant 0 : i32
    %c0_i32_1 = arith.constant 0 : i32
    %c0_i32_2 = arith.constant 0 : i32
    return %c0_i32, %c0_i32_0, %c0_i32_1 : i32, i32, i32
  }
  func.func @transform_8(%arg0: i32, %arg1: i32) -> (i32, i32, i32) {
    %c0_i32 = arith.constant 0 : i32
    %c0_i32_0 = arith.constant 0 : i32
    %c0_i32_1 = arith.constant 0 : i32
    %c0_i32_2 = arith.constant 0 : i32
    return %c0_i32, %c0_i32_0, %c0_i32_1 : i32, i32, i32
  }
  func.func @transform_9(%arg0: i32, %arg1: i32) -> (i32, i32, i32) {
    %c0_i32 = arith.constant 0 : i32
    %c0_i32_0 = arith.constant 0 : i32
    %c0_i32_1 = arith.constant 0 : i32
    %c0_i32_2 = arith.constant 0 : i32
    return %c0_i32, %c0_i32_0, %c0_i32_1 : i32, i32, i32
  }
  func.func @transform_10(%arg0: i32, %arg1: i32) -> (i32, i32, i32) {
    %c0_i32 = arith.constant 0 : i32
    %c0_i32_0 = arith.constant 0 : i32
    %c0_i32_1 = arith.constant 0 : i32
    %c0_i32_2 = arith.constant 0 : i32
    return %c0_i32, %c0_i32_0, %c0_i32_1 : i32, i32, i32
  }
  func.func @transform_11(%arg0: i32, %arg1: i32) -> (i32, i32, i32) {
    %c0_i32 = arith.constant 0 : i32
    %c0_i32_0 = arith.constant 0 : i32
    %c0_i32_1 = arith.constant 0 : i32
    %c0_i32_2 = arith.constant 0 : i32
    return %c0_i32, %c0_i32_0, %c0_i32_1 : i32, i32, i32
  }
  func.func @transform_12(%arg0: i32, %arg1: i32) -> (i32, i32, i32) {
    %c0_i32 = arith.constant 0 : i32
    %c0_i32_0 = arith.constant 0 : i32
    %c0_i32_1 = arith.constant 0 : i32
    %c0_i32_2 = arith.constant 0 : i32
    return %c0_i32, %c0_i32_0, %c0_i32_1 : i32, i32, i32
  }
  func.func @transform_13(%arg0: i32, %arg1: i32) -> (i32, i32, i32) {
    %c0_i32 = arith.constant 0 : i32
    %c0_i32_0 = arith.constant 0 : i32
    %c0_i32_1 = arith.constant 0 : i32
    %c0_i32_2 = arith.constant 0 : i32
    return %c0_i32, %c0_i32_0, %c0_i32_1 : i32, i32, i32
  }
  func.func @transform_14(%arg0: i32, %arg1: i32) -> (i32, i32, i32) {
    %c0_i32 = arith.constant 0 : i32
    %c0_i32_0 = arith.constant 0 : i32
    %c0_i32_1 = arith.constant 0 : i32
    %c0_i32_2 = arith.constant 0 : i32
    return %c0_i32, %c0_i32_0, %c0_i32_1 : i32, i32, i32
  }
  func.func @transform_15(%arg0: i32, %arg1: i32) -> (i32, i32, i32) {
    %c0_i32 = arith.constant 0 : i32
    %c0_i32_0 = arith.constant 0 : i32
    %c0_i32_1 = arith.constant 0 : i32
    %c0_i32_2 = arith.constant 0 : i32
    return %c0_i32, %c0_i32_0, %c0_i32_1 : i32, i32, i32
  }
  func.func @transform_16(%arg0: i32, %arg1: i32) -> (i32, i32, i32) {
    %c0_i32 = arith.constant 0 : i32
    %c0_i32_0 = arith.constant 0 : i32
    %c0_i32_1 = arith.constant 0 : i32
    %c0_i32_2 = arith.constant 0 : i32
    return %c0_i32, %c0_i32_0, %c0_i32_1 : i32, i32, i32
  }
  func.func @transform_17(%arg0: i32, %arg1: i32) -> (i32, i32, i32) {
    %c0_i32 = arith.constant 0 : i32
    %c0_i32_0 = arith.constant 0 : i32
    %c0_i32_1 = arith.constant 0 : i32
    %c0_i32_2 = arith.constant 0 : i32
    return %c0_i32, %c0_i32_0, %c0_i32_1 : i32, i32, i32
  }
  func.func @transform_18(%arg0: i32, %arg1: i32) -> (i32, i32) {
    %c0_i32 = arith.constant 0 : i32
    %c0_i32_0 = arith.constant 0 : i32
    %c0_i32_1 = arith.constant 0 : i32
    return %c0_i32, %c0_i32_0 : i32, i32
  }
  func.func @transform_19(%arg0: i32, %arg1: i32) -> (i32, i32) {
    %c0_i32 = arith.constant 0 : i32
    %c0_i32_0 = arith.constant 0 : i32
    %c0_i32_1 = arith.constant 0 : i32
    return %c0_i32, %c0_i32_0 : i32, i32
  }
  func.func @transform_20(%arg0: i32, %arg1: i32) -> (i32, i32, i32) {
    %c0_i32 = arith.constant 0 : i32
    %c0_i32_0 = arith.constant 0 : i32
    %c0_i32_1 = arith.constant 0 : i32
    return %arg0, %c0_i32, %c0_i32_0 : i32, i32, i32
  }
}

</mosaic_0001>

<bundles_post_ra>
// kernel: tpu_custom_call.1
= control target key start
LH: loop header
LB: loop body
LE: loop exit
PB: predicated region body
PF: predicated region fallthrough
CT: control target
= control target key end

     0   :  { %s3499_s0 = inlined_call_operand.hbm [shape: f32[2,8,32], index: 0, kind: input, shape index: {}]   ;;  %s3500_s1 = inlined_call_operand.vmem [shape: f32[2,1,8], index: 1, kind: input, shape index: {}]   ;;  %s3501_s2 = inlined_call_operand.vmem [shape: f32[2,1,32], index: 2, kind: input, shape index: {}]   ;;  %s3502_s3 = inlined_call_operand.vmem [shape: f32[2,1,32], index: 3, kind: input, shape index: {}]   ;;  %s3503_s4 = inlined_call_operand.vmem [shape: bf16[2,32,32], index: 4, kind: input, shape index: {}]   ;;  %s3504_s5 = inlined_call_operand.vmem [shape: f32[2,1,32], index: 5, kind: input, shape index: {}]   ;;  %s3505_s6 = inlined_call_operand.vmem [shape: bf16[2,32,32], index: 6, kind: input, shape index: {}]   ;;  %s3506_s7 = inlined_call_operand.vmem [shape: f32[2,1,32], index: 7, kind: input, shape index: {}]   ;;  %s3507_s8 = inlined_call_operand.vmem [shape: bf16[2,32,32], index: 8, kind: input, shape index: {}]   ;;  %s3508_s9 = inlined_call_operand.vmem [shape: f32[2,1,32], index: 9, kind: input, shape index: {}]   ;;  %s3509_s10 = inlined_call_operand.hbm [shape: bf16[2,32,32], index: 10, kind: input, shape index: {}]   ;;  %s3510_s11 = inlined_call_operand.vmem [shape: f32[2,1,32], index: 11, kind: input, shape index: {}]   ;;  %s3511_s12 = inlined_call_operand.vmem [shape: f32[2,1,32], index: 12, kind: input, shape index: {}]   ;;  %s3512_s13 = inlined_call_operand.vmem [shape: f32[2,1,32], index: 13, kind: input, shape index: {}]   ;;  %s3513_s14 = inlined_call_operand.hbm [shape: bf16[2,32,64], index: 14, kind: input, shape index: {}]   ;;  %s3514_s15 = inlined_call_operand.vmem [shape: f32[2,1,64], index: 15, kind: input, shape index: {}]   ;;  %s3515_s16 = inlined_call_operand.vmem [shape: bf16[2,64,32], index: 16, kind: input, shape index: {}]   ;;  %s3516_s17 = inlined_call_operand.vmem [shape: f32[2,1,32], index: 17, kind: input, shape index: {}]   ;;  %s3517_s18 = inlined_call_operand.vmem [shape: f32[1,32], index: 18, kind: input, shape index: {}]   ;;  %s3518_s19 = inlined_call_operand.vmem [shape: f32[1,32], index: 19, kind: input, shape index: {}]   ;;  %s3519_s20 = inlined_call_operand.hbm [shape: f32[2,8,32], index: 20, kind: output, shape index: {}]  }
   0x1   :  { %3531 = sst [smem:[#allocation16_spill]] %s3499_s0 }
   0x2   :  { %3532 = sst [smem:[#allocation17_spill]] %s3500_s1 }
   0x3   :  { %3533 = sst [smem:[#allocation18_spill]] %s3501_s2 }
   0x4   :  { %3534 = sst [smem:[#allocation19_spill]] %s3502_s3 }
   0x5   :  { %3535 = sst [smem:[#allocation20_spill]] %s3503_s4 }
   0x6   :  { %3536 = sst [smem:[#allocation21_spill]] %s3512_s13 }
   0x7   :  { %3537 = sst [smem:[#allocation22_spill]] %s3514_s15 }
   0x8   :  { %3538 = sst [smem:[#allocation23_spill]] %s3516_s17 }
   0x9   :  { %3539 = sst [smem:[#allocation24_spill]] %s3517_s18 }
   0xa   :  { %3540 = sst [smem:[#allocation25_spill]] %s3518_s19 }
   0xb   :  { %3541 = sst [smem:[#allocation26_spill]] %s3519_s20 }
   0xc   :  { %25 = vsyncpa [#allocation5], 0 }
   0xd   :  { %26 = vsyncpa [#allocation8], 0 }
   0xe   :  { %27 = vsyncpa [#allocation6], 0  ;;  %s3017_s1 = smov 0   ;;  %s3019_s22 = smov 0  }
   0xf   :  { %s3021_s23 = smov 0  }
  0x10 LB: > { %3542 = sst [smem:[#allocation14_spill]] %s2889_s22  ;;  %s2895_s24 = smov [#allocation7]   ;;  %s2893_s23 = sphi %s3021_s23, %s33_s23   ;;  %s2889_s22 = sphi %s3019_s22, %s3569_s22   ;;  %s2885_s1 = sphi %s3017_s1, %s3568_s1  }
  0x11   : > { %3543 = sst [smem:[#allocation15_spill]] %s2893_s23  ;;  %s566_s2 = sshll.u32 %s2895_s24, 4  ;;  %s3041_s2 = int_to_ptr.vmem [resolvable:$true] %s566_s2 }
  0x12   : > { %s3522_s25 = sadd.s32 4294967295, %s2893_s23   ;;  %p2337_p0 = scmp.ge.s32.totalorder %s2893_s23, 1 }
  0x13   : > { %p506_p1 = scmp.lt.s32.totalorder %s2893_s23, 3  ;;  %p3037_p2 = scmp.eq.s32.totalorder %s3522_s25, 0 }
  0x14   : > { %s42_s28 = sadd.s32 1, %s2889_s22  ;;  %s2896_s29 = smov [#allocation4]  }
  0x15   : > { %s3544_s3 = scalar_select %p3037_p2, 1, 0 }
  0x16   : > { %p3043_p3 = pnand %p2337_p0, %p506_p1  ;;  %p3056_p6 = scmp.ge.s32.totalorder %s42_s28, 2 }
  0x17   : > { %s521_s30 = sshll.u32 %s2896_s29, 4  ;;  %s2749_s24 = scalar_lea.hbm %s3509_s10, 512  ;;  %s522_s30 = int_to_ptr.vmem [resolvable:$true] %s521_s30 }
  0x18   : > { %s3545_s26 = scalar_select %p3043_p3, 1, 0 }
  0x19   : > { %p2632_p4 = pneg %p3043_p3  ;;  %p2750_p7 = scmp.ne.s32.totalorder %s3509_s10, %s2749_s24 }
  0x1a   : > { %p2756_p11 = scmp.lt.u32.totalorder %s2749_s24, %s3509_s10 }
  0x1b   : > { %p3051_p5 = pnand %p3037_p2, %p2632_p4 }
  0x1d   : > { %p3068_p8 = pneg %p3051_p5 }
  0x1f   : > { %p2752_p9 = pnand %p3068_p8, %p2750_p7 }
  0x21   : > { %p2753_p10 = pneg %p2752_p9 }
  0x23   : > { %p2758_p12 = pnand %p2756_p11, %p2753_p10 }
  0x25   : > { %2761 = shalt.err (!%p2758_p12)
}
  0x26   : > { %s2762_s20 = scalar_lea.vmem %s3041_s2, 512  ;;  %p2770_p4 = scmp.lt.s32.totalorder %s3041_s2, %s3041_s2 }
  0x27   : > { %p2763_p13 = scmp.ne.s32.totalorder %s3041_s2, %s2762_s20  ;;  %p2771_p2 = scmp.lt.s32.totalorder %s2762_s20, %s2762_s20 }
  0x29   : > { %p2765_p0 = pnand %p2763_p13, %p3068_p8  ;;  %p2772_p7 = por %p2771_p2, %p2770_p4 }
  0x2b   : > { %p2766_p1 = pneg %p2765_p0 }
  0x2d   : > { %p2773_p9 = pnand %p2772_p7, %p2766_p1 }
  0x2f   : > { %2776 = shalt.err (!%p2773_p9)
}
  0x30   : > { %s3529_s25 = smov 64   ;;  %s3530_s19 = smov 4  }
  0x31   : > { %2638 = dma.hbm_to_vmem [thread:$0]  (!%p3051_p5), %s3509_s10, 512, %s3041_s2, [#allocation8], %s3529_s25, %s3529_s25, %s3530_s19  }
  0x32   : > { %s3571_s28 = smov (%p3056_p6, %s42_s28), 0  ;;  %s3549_s24 = sld [smem:[#allocation16_spill]] }
  0x38   : > { %s2777_s20 = scalar_lea.hbm %s3549_s24, 256 }
  0x39   : > { %p2778_p2 = scmp.ne.s32.totalorder %s3549_s24, %s2777_s20  ;;  %p2784_p12 = scmp.lt.u32.totalorder %s2777_s20, %s3549_s24 }
  0x3b   : > { %p2780_p10 = pnand %p2778_p2, %p3068_p8 }
  0x3d   : > { %p2781_p11 = pneg %p2780_p10 }
  0x3f   : > { %p2786_p13 = pnand %p2784_p12, %p2781_p11 }
  0x41   : > { %2789 = shalt.err (!%p2786_p13)
}
  0x42   : > { %s2790_s2 = scalar_lea.vmem %s522_s30, 256  ;;  %p2798_p4 = scmp.lt.s32.totalorder %s522_s30, %s522_s30 }
  0x43   : > { %p2791_p6 = scmp.ne.s32.totalorder %s522_s30, %s2790_s2  ;;  %p2799_p7 = scmp.lt.s32.totalorder %s2790_s2, %s2790_s2 }
  0x45   : > { %p2793_p0 = pnand %p2791_p6, %p3068_p8  ;;  %p2800_p9 = por %p2799_p7, %p2798_p4 }
  0x47   : > { %p2794_p1 = pneg %p2793_p0 }
  0x49   : > { %p2801_p3 = pnand %p2800_p9, %p2794_p1 }
  0x4b   : > { %2804 = shalt.err (!%p2801_p3)
}
  0x4c   : > { %s2899_s17 = smov 128   ;;  %s2900_s18 = smov 8  }
  0x4d   : > { %2635 = dma.hbm_to_vmem [thread:$0]  (!%p3051_p5), %s3549_s24, 256, %s522_s30, [#allocation5], %s2899_s17, %s2899_s17, %s2900_s18  }
  0x4e   : > { %s2901_s4 = smov [#allocation9]   ;;  %s2805_s21 = scalar_lea.hbm %s3513_s14, 512 }
  0x4f   : > { %s588_s22 = sshll.u32 %s2901_s4, 4  ;;  %p2806_p3 = scmp.ne.s32.totalorder %s3513_s14, %s2805_s21  ;;  %s589_s22 = int_to_ptr.vmem [resolvable:$true] %s588_s22 }
  0x50   : > { %p2812_p11 = scmp.lt.u32.totalorder %s2805_s21, %s3513_s14 }
  0x51   : > { %p2808_p2 = pnand %p2806_p3, %p3068_p8 }
  0x53   : > { %p2809_p10 = pneg %p2808_p2 }
  0x55   : > { %p2814_p12 = pnand %p2812_p11, %p2809_p10 }
  0x57   : > { %2817 = shalt.err (!%p2814_p12)
}
  0x58   : > { %s2818_s30 = scalar_lea.vmem %s589_s22, 512  ;;  %p2826_p1 = scmp.lt.s32.totalorder %s589_s22, %s589_s22 }
  0x59   : > { %p2819_p13 = scmp.ne.s32.totalorder %s589_s22, %s2818_s30  ;;  %p2827_p4 = scmp.lt.s32.totalorder %s2818_s30, %s2818_s30 }
  0x5b   : > { %p2821_p6 = pnand %p2819_p13, %p3068_p8  ;;  %p2828_p7 = por %p2827_p4, %p2826_p1 }
  0x5d   : > { %p2822_p0 = pneg %p2821_p6 }
  0x5f   : > { %p2829_p9 = pnand %p2828_p7, %p2822_p0 }
  0x61   : > { %2832 = shalt.err (!%p2829_p9)
}
  0x62   : > { %s3550_s17 = smov 4   ;;  %s3551_s18 = smov 64  }
  0x63   : > { %2641 = dma.hbm_to_vmem [thread:$0]  (!%p3051_p5), %s3513_s14, 512, %s589_s22, [#allocation8], %s3551_s18, %s3551_s18, %s3550_s17  }
  0x64   : > { %p3552_p3 = scmp.ne.s32.totalorder %s3545_s26, 0 }
  0x65   : > { %p3553_p8 = scmp.ne.s32.totalorder (!%p3552_p3), %s3544_s3, 0 }
  0x66   : > { %619 = sbr.rel (%p3552_p3) target bundleno = 2913 (0xb61), region = 100 }
  0x6d   : > { %2872 = dma.done.wait (%p3553_p8), [#allocation5], 256  }
  0x6e   : > { %2874 = vsyncadd (%p3553_p8), [#allocation5], 4294967040 }
  0x6f   : > { %2876 = dma.done.wait (%p3553_p8), [#allocation8], 1024  }
  0x70   : > { %2878 = vsyncadd (%p3553_p8), [#allocation8], 4294966272  ;;  %p2346_p2 = scmp.ne.s32.totalorder %s2885_s1, 0 }
  0x71   : > { %v691_v0 = vld [vmem:[#allocation4] sm:$0xff] (!%p2346_p2)  ;;  %vm693_vm0 = vcmask (!%p2346_p2), 261120   ;;  %v692_v1 = vld [vmem:[#allocation4 + $0x8] sm:$0xff] (!%p2346_p2) }
  0x72   : > { %690 = sbr.rel (%p2346_p2) target bundleno = 121 (0x79), region = 116  ;;  %694 = vst.msk [vmem:[#allocation2] sm:$0xff] (!%p2346_p2), %vm693_vm0, %v691_v0  ;;  %695 = vst.msk [vmem:[#allocation2 + $0x8] sm:$0xff] (!%p2346_p2), %vm693_vm0, %v692_v1 }
  0x79 PF: > { %v3146_v2 = vld [vmem:[#allocation2] sm:$0xff]  ;;  %vm704_vm1 = vcmask 261120   ;;  %v3148_v3 = vld [vmem:[#allocation2 + $0x8] sm:$0xff]  ;;  %s3159_s23 = sshll.u32 %s2885_s1, 4  ;;  %s3554_s27 = sld [smem:[#allocation20_spill]]  ;;  %v2902_v17 = vmov 0.0  }
  0x7a   : > { %v705_v4 = vsel %vm704_vm1, %v3146_v2, 0.0  ;;  %v708_v5 = vsel %vm704_vm1, %v3148_v3, 0.0  ;;  %s827_s22 = scalar_lea.vmem %s3505_s6, %s3159_s23  ;;  %2468 = vmatprep.subr.bf16.mxu0 %v2902_v17  ;;  %2476 = vmatprep.subr.bf16.mxu1 %v2902_v17  ;;  %vm2903_vm2 = vmmov 0   ;;  %s894_s21 = scalar_lea.vmem %s3507_s8, %s3159_s23  ;;  %vm971_vm3 = vcmask 64512  }
  0x7b   : > { %706 = vadd.xlane.f32.xlu0 %v705_v4  ;;  %v2692_v18 = vld [vmem:[%s827_s22] sm:$0xff]   ;;  %2472 = vmatprep.mubr.msk.bf16.mxu0 %vm2903_vm2, %v2902_v17  ;;  %v2694_v20 = vld [vmem:[%s827_s22 + $0x8] sm:$0xff]   ;;  %s3555_s30 = sld [smem:[#allocation18_spill]]  ;;  %s3556_s19 = sld [smem:[#allocation19_spill]]  ;;  %vm1032_vm4 = vcmask 1043456   ;;  %vm1195_vm5 = vcmask 130112  }
  0x7c   : > { %2477 = vmatpush3.bf16.msra.mxu1 %v2692_v18  ;;  %2480 = vmatprep.mubr.msk.bf16.mxu1 %vm2903_vm2, %v2902_v17  ;;  %v2695_v37 = vld [vmem:[%s894_s21] sm:$0xff]   ;;  %v2696_v39 = vld [vmem:[%s894_s21 + $0x8] sm:$0xff]   ;;  %s832_s22 = scalar_lea.vmem %s3506_s7, %s2885_s1  ;;  %s899_s21 = scalar_lea.vmem %s3508_s9, %s2885_s1  ;;  %vm1311_vm6 = vcmask 195712   ;;  %vm1427_vm7 = vcmask 261312   ;;  %vm2120_vm8 = vcmask 523264  }
  0x7d   : > { %2478 = vmatprep.subr.bf16.mxu1 %v2902_v17  ;;  %v2357_v42 = vld [vmem:[%s832_s22] ss:$0 sm:$0xff]  ;;  %s2904_s20 = smov 120   ;;  %s2905_s2 = smov 104  }
  0x7e   : > { %v2362_v59 = vld [vmem:[%s899_s21] ss:$0 sm:$0xff]  ;;  %s3557_s25 = sld [smem:[#allocation17_spill]]  ;;  %s2907_s26 = smov 8  }
  0x7f   : > { %709 = vadd.xlane.f32.xlu0 %v708_v5  ;;  %s757_s13 = scalar_lea.vmem %s3554_s27, %s3159_s23  ;;  %s2908_s27 = smov 16  }
  0x80   : > { %v2691_v16 = vld [vmem:[%s757_s13] sm:$0xff]   ;;  %v2693_v19 = vld [vmem:[%s757_s13 + $0x8] sm:$0xff]   ;;  %2479 = vmatpush3.bf16.msra.mxu1 %v2694_v20  ;;  %s762_s13 = scalar_lea.vmem %s3504_s5, %s2885_s1  ;;  %s751_s15 = scalar_lea.vmem [#allocation7], %s3159_s23 }
  0x81   : > { %2469 = vmatpush3.bf16.msra.mxu0 %v2691_v16  ;;  %2492 = vmatprep.subr.bf16.mxu1 %v2902_v17  ;;  %s700_s17 = scalar_lea.vmem %s3555_s30, %s2885_s1  ;;  %s702_s3 = scalar_lea.vmem %s3556_s19, %s2885_s1  ;;  %v2352_v40 = vld [vmem:[%s762_s13] ss:$0 sm:$0xff] }
  0x82   : > { %2470 = vmatprep.subr.bf16.mxu0 %v2902_v17  ;;  %v2347_v29 = vld [vmem:[%s700_s17] ss:$0 sm:$0xff]  ;;  %s2906_s30 = smov 112   ;;  %s2909_s13 = smov 24  }
  0x83   : > { %v2348_v33 = vld [vmem:[%s702_s3] ss:$0 sm:$0xff]  ;;  %s1891_s29 = scalar_lea.vmem %s3510_s11, %s2885_s1  ;;  %s2005_s0 = scalar_lea.vmem [#allocation9], %s3159_s23 }
  0x84   : > { %s2415_s21 = sshll.u32 %s2885_s1, 5  ;;  %s1957_s18 = scalar_lea.vmem %s3511_s12, %s2885_s1 }
  0x85   : > { %2471 = vmatpush3.bf16.msra.mxu0 %v2693_v19  ;;  %s3559_s22 = sld [smem:[#allocation22_spill]]  ;;  %p2403_p5 = scmp.ne.s32.totalorder %s2885_s1, 1 }
  0x86   : > { %2484 = vmatprep.subr.bf16.mxu0 %v2902_v17  ;;  %s3561_s23 = sld [smem:[#allocation24_spill]] (!%p2403_p5)  ;;  %s3562_s19 = sld [smem:[#allocation25_spill]] (!%p2403_p5) }
 0x108   : > { %v707_v6 = vpop.xlane.xlu0 %706 }
 0x109   : > { %v712_v7 = vmul.f32 0.03125, %v707_v6 }
 0x10b   : > { %v714_v8 = vsub.f32 %v3146_v2, %v712_v7 }
 0x10c   : > { %v710_v9 = vpop.xlane.xlu0 %709 }
 0x10d   : > { %v713_v10 = vmul.f32 0.03125, %v710_v9  ;;  %v716_v11 = vmul.f32 %v714_v8, %v714_v8 }
 0x10f   : > { %v715_v12 = vsub.f32 %v3148_v3, %v713_v10  ;;  %v718_v13 = vsel %vm704_vm1, %v716_v11, 0.0 }
 0x110   : > { %719 = vadd.xlane.f32.xlu1 %v718_v13 }
 0x111   : > { %v717_v14 = vmul.f32 %v715_v12, %v715_v12 }
 0x113   : > { %v721_v15 = vsel %vm704_vm1, %v717_v14, 0.0 }
 0x114   : > { %722 = vadd.xlane.f32.xlu1 %v721_v15 }
 0x19d   : > { %v720_v21 = vpop.xlane.xlu1 %719 }
 0x19e   : > { %v724_v22 = vmul.f32 0.03125, %v720_v21 }
 0x1a0   : > { %v726_v23 = vadd.f32 1e-06, %v724_v22 }
 0x1a1   : > { %v723_v24 = vpop.xlane.xlu1 %722 }
 0x1a2   : > { %2705 = vrsqrt.f32 %v726_v23  ;;  %v725_v25 = vmul.f32 0.03125, %v723_v24 }
 0x1a4   : > { %v727_v26 = vadd.f32 1e-06, %v725_v25 }
 0x1a6   : > { %2707 = vrsqrt.f32 %v727_v26 }
 0x1ac   : > { %v2706_v27 = vpop.eup %2705 }
 0x1ad   : > { %v730_v28 = vmul.f32 %v2706_v27, %v714_v8 }
 0x1af   : > { %v738_v32 = vmul.f32 %v2347_v29, %v730_v28  ;;  %v2366_v28 = vld [vmem:[%s3557_s25] ss:$0 sm:$0xff] }
 0x1b0   : > { %v2708_v30 = vpop.eup %2707 }
 0x1b1   : > { %v731_v31 = vmul.f32 %v2708_v30, %v715_v12  ;;  %v746_v35 = vadd.f32 %v2348_v33, %v738_v32 }
 0x1b3   : > { %v739_v34 = vmul.f32 %v2347_v29, %v731_v31 }
 0x1b5   : > { %v747_v36 = vadd.f32 %v2348_v33, %v739_v34 }
 0x1b7   : > { %v748_v38 = vpack.c.bf16 %v747_v36, %v746_v35 }
 0x1b9   : > { %2473 = vmatmul.mubr.msk.bf16.vlgmr.msra.gmra.mrb[0].mxu0 %vm704_vm1, %v748_v38  ;;  %2481 = vmatmul.mubr.msk.bf16.vlgmr.msra.gmra.mrb[0].mxu1 %vm704_vm1, %v748_v38 }
 0x1ba   : > { %2485 = vmatpush3.bf16.msra.mxu0 %v2695_v37  ;;  %2488 = vmatprep.mubr.msk.bf16.mxu0 %vm2903_vm2, %v2902_v17 }
 0x1bb   : > { %2486 = vmatprep.subr.bf16.mxu0 %v2902_v17  ;;  %2494 = vmatprep.mubr.msk.bf16.mxu1 %vm2903_vm2, %v2902_v17 }
 0x1be   : > { %2487 = vmatpush3.bf16.msra.mxu0 %v2696_v39 }
 0x1bf   : > { %2498 = vmatprep.subr.bf16.mxu0 %v2902_v17 }
 0x1c1   : > { %2489 = vmatmul.mubr.msk.bf16.vlgmr.msra.gmra.mrb[4].mxu0 %vm704_vm1, %v748_v38 }
 0x1c2   : > { %2500 = vmatprep.mubr.msk.bf16.mxu0 %vm2903_vm2, %v2902_v17 }
 0x28c   : > { %v819_v41 = vpop.f32.mrb[0].mxu0  ;;  %v886_v43 = vpop.f32.mrb[0].mxu1 }
 0x28d   : > { %v820_v44 = vadd.f32 %v2352_v40, %v819_v41  ;;  %v2474_v45 = vpop.f32.mrb[1].mxu0  ;;  %v2482_v46 = vpop.f32.mrb[1].mxu1  ;;  %v887_v49 = vadd.f32 %v2357_v42, %v886_v43 }
 0x28e   : > { %v822_v47 = vpop.f32.mrb[2].mxu0  ;;  %v889_v48 = vpop.f32.mrb[2].mxu1 }
 0x28f   : > { %v823_v50 = vadd.f32 %v2352_v40, %v822_v47  ;;  %v890_v51 = vadd.f32 %v2357_v42, %v889_v48  ;;  %v2475_v52 = vpop.f32.mrb[3].mxu0  ;;  %v2483_v53 = vpop.f32.mrb[3].mxu1  ;;  %v960_v54 = vmul.f32 0.35355338, %v820_v44 }
 0x291   : > { %v961_v55 = vmul.f32 0.35355338, %v823_v50  ;;  %v963_v56 = vpack.c.bf16 %v890_v51, %v887_v49 }
 0x293   : > { %v962_v57 = vpack.c.bf16 %v961_v55, %v960_v54  ;;  %1082 = vrot.lane.b32.xlu0 %v963_v56, %s2904_s20  ;;  %v976_v58 = vsel %vm971_vm3, %v963_v56, 0  ;;  %v1436_v5 = vrot.slane %v963_v56, 4  ;;  %v2375_v54 = vld [vmem:[%s3557_s25 + $0x1] ss:$0 sm:$0xff] }
 0x294   : > { %v953_v60 = vpop.f32.mrb[4].mxu0  ;;  %2493 = vmatpush3.bf16.xpose.msra.mxu1 %v976_v58 }
 0x295   : > { %1079 = vrot.lane.b32.xlu1 %v962_v57, %s2904_s20  ;;  %v2490_v61 = vpop.f32.mrb[5].mxu0  ;;  %2504 = vmatprep.subr.bf16.mxu1 %v2902_v17  ;;  %v954_v63 = vadd.f32 %v2362_v59, %v953_v60  ;;  %v1435_v7 = vrot.slane %v962_v57, 4  ;;  %v1441_v18 = vsel %vm971_vm3, %v1436_v5, 0 }
 0x296   : > { %v956_v62 = vpop.f32.mrb[6].mxu0 }
 0x297   : > { %v957_v0 = vadd.f32 %v2362_v59, %v956_v62  ;;  %1315 = vrot.lane.b32.xlu0 %v963_v56, %s2905_s2  ;;  %v2491_v1 = vpop.f32.mrb[7].mxu0 }
 0x299   : > { %v3219_v4 = vpack.c.bf16 %v957_v0, %v954_v63  ;;  %1199 = vrot.lane.b32.xlu1 %v963_v56, %s2906_s30 }
 0x29b   : > { %1545 = vrot.lane.b32.xlu0 %v1436_v5, %s2904_s20  ;;  %2495 = vmatmul.mubr.msk.bf16.vlgmr.msra.gmra.mrb[4].mxu1 %vm971_vm3, %v962_v57  ;;  %v1034_v6 = vsel %vm1032_vm4, %v3219_v4, 0  ;;  %v3292_v53 = vrot.slane %v3219_v4, 4 }
 0x29c   : > { %2499 = vmatpush3.bf16.msra.mxu0 %v1034_v6  ;;  %2506 = vmatprep.mubr.msk.bf16.mxu1 %vm2903_vm2, %v2902_v17 }
 0x29d   : > { %1197 = vrot.lane.b32.xlu1 %v962_v57, %s2906_s30  ;;  %2510 = vmatprep.subr.bf16.mxu0 %v2902_v17 }
 0x29f   : > { %1660 = vrot.lane.b32.xlu0 %v1436_v5, %s2906_s30 }
 0x2a1   : > { %1313 = vrot.lane.b32.xlu1 %v962_v57, %s2905_s2 }
 0x2a3   : > { %1775 = vrot.lane.b32.xlu0 %v1436_v5, %s2905_s2 }
 0x2a5   : > { %1543 = vrot.lane.b32.xlu1 %v1435_v7, %s2904_s20 }
 0x2a7   : > { %1258 = vrot.lane.b32.xlu0 %v3219_v4, %s2906_s30 }
 0x2a9   : > { %1658 = vrot.lane.b32.xlu1 %v1435_v7, %s2906_s30 }
 0x2ad   : > { %1773 = vrot.lane.b32.xlu1 %v1435_v7, %s2905_s2 }
 0x2b1   : > { %1142 = vrot.lane.b32.xlu1 %v3219_v4, %s2904_s20 }
 0x305   : > { %v1083_v8 = vpop.permute.xlu0 %1082 }
 0x306   : > { %v1088_v9 = vsel %vm971_vm3, %v1083_v8, 0 }
 0x307   : > { %v1080_v10 = vpop.permute.xlu1 %1079  ;;  %2505 = vmatpush3.bf16.xpose.msra.mxu1 %v1088_v9 }
 0x308   : > { %2516 = vmatprep.subr.bf16.mxu1 %v2902_v17 }
 0x309   : > { %v1316_v13 = vpop.permute.xlu0 %1315 }
 0x30a   : > { %v1321_v15 = vsel %vm971_vm3, %v1316_v13, 0 }
 0x30b   : > { %v1200_v11 = vpop.permute.xlu1 %1199 }
 0x30c   : > { %v1205_v12 = vsel %vm971_vm3, %v1200_v11, 0 }
 0x30d   : > { %v1546_v19 = vpop.permute.xlu0 %1545 }
 0x30e   : > { %2507 = vmatmul.mubr.msk.bf16.vlgmr.msra.gmra.mrb[8].mxu1 %vm971_vm3, %v1080_v10  ;;  %v1551_v20 = vsel %vm971_vm3, %v1546_v19, 0 }
 0x30f   : > { %2517 = vmatpush3.bf16.xpose.msra.mxu1 %v1205_v12  ;;  %2518 = vmatprep.mubr.msk.bf16.mxu1 %vm2903_vm2, %v2902_v17  ;;  %v1198_v14 = vpop.permute.xlu1 %1197 }
 0x310   : > { %2528 = vmatprep.subr.bf16.mxu1 %v2902_v17 }
 0x311   : > { %v1661_v21 = vpop.permute.xlu0 %1660 }
 0x312   : > { %v1666_v23 = vsel %vm971_vm3, %v1661_v21, 0 }
 0x313   : > { %v1314_v16 = vpop.permute.xlu1 %1313 }
 0x315   : > { %v1776_v24 = vpop.permute.xlu0 %1775 }
 0x316   : > { %2519 = vmatmul.mubr.msk.bf16.vlgmr.msra.gmra.mrb[12].mxu1 %vm971_vm3, %v1198_v14  ;;  %v1781_v26 = vsel %vm971_vm3, %v1776_v24, 0 }
 0x317   : > { %2529 = vmatpush3.bf16.xpose.msra.mxu1 %v1321_v15  ;;  %2530 = vmatprep.mubr.msk.bf16.mxu1 %vm2903_vm2, %v2902_v17  ;;  %v1544_v22 = vpop.permute.xlu1 %1543 }
 0x318   : > { %2540 = vmatprep.subr.bf16.mxu1 %v2902_v17 }
 0x319   : > { %v1259_v58 = vpop.permute.xlu0 %1258 }
 0x31b   : > { %v1659_v25 = vpop.permute.xlu1 %1658 }
 0x31e   : > { %2531 = vmatmul.mubr.msk.bf16.vlgmr.msra.gmra.mrb[16].mxu1 %vm971_vm3, %v1314_v16 }
 0x31f   : > { %2541 = vmatpush3.bf16.xpose.msra.mxu1 %v1441_v18  ;;  %2542 = vmatprep.mubr.msk.bf16.mxu1 %vm2903_vm2, %v2902_v17  ;;  %v1774_v27 = vpop.permute.xlu1 %1773 }
 0x320   : > { %2552 = vmatprep.subr.bf16.mxu1 %v2902_v17 }
 0x323   : > { %v1143_v13 = vpop.permute.xlu1 %1142 }
 0x324   : > { %v1148_v15 = vsel %vm1032_vm4, %v1143_v13, 0 }
 0x326   : > { %2543 = vmatmul.mubr.msk.bf16.vlgmr.msra.gmra.mrb[20].mxu1 %vm971_vm3, %v1435_v7 }
 0x327   : > { %2553 = vmatpush3.bf16.xpose.msra.mxu1 %v1551_v20  ;;  %2554 = vmatprep.mubr.msk.bf16.mxu1 %vm2903_vm2, %v2902_v17 }
 0x328   : > { %2564 = vmatprep.subr.bf16.mxu1 %v2902_v17 }
 0x32e   : > { %2555 = vmatmul.mubr.msk.bf16.vlgmr.msra.gmra.mrb[24].mxu1 %vm971_vm3, %v1544_v22 }
 0x32f   : > { %2565 = vmatpush3.bf16.xpose.msra.mxu1 %v1666_v23  ;;  %2566 = vmatprep.mubr.msk.bf16.mxu1 %vm2903_vm2, %v2902_v17 }
 0x330   : > { %2576 = vmatprep.subr.bf16.mxu1 %v2902_v17 }
 0x336   : > { %2567 = vmatmul.mubr.msk.bf16.vlgmr.msra.gmra.mrb[28].mxu1 %vm971_vm3, %v1659_v25 }
 0x337   : > { %2577 = vmatpush3.bf16.xpose.msra.mxu1 %v1781_v26  ;;  %2578 = vmatprep.mubr.msk.bf16.mxu1 %vm2903_vm2, %v2902_v17 }
 0x338   : > { %2588 = vmatprep.subr.bf16.mxu1 %v2902_v17 }
 0x33e   : > { %2579 = vmatmul.mubr.msk.bf16.vlgmr.msra.gmra.mrb[32].mxu1 %vm971_vm3, %v1774_v27 }
 0x33f   : > { %2592 = vmatprep.mubr.msk.bf16.mxu1 %vm2903_vm2, %v2902_v17 }
 0x36e   : > { %v1012_v29 = vpop.f32.mrb[4].mxu1 }
 0x36f   : > { %v1013_v30 = vadd.f32 %v2366_v28, %v1012_v29  ;;  %v2496_v31 = vpop.f32.mrb[5].mxu1 }
 0x370   : > { %v1015_v32 = vpop.f32.mrb[6].mxu1 }
 0x371   : > { %v2497_v33 = vpop.f32.mrb[7].mxu1  ;;  %v1018_v34 = vsel %vm971_vm3, %v1013_v30, -inf }
 0x372   : > { %1019 = vmax.xlane.f32.xlu0 %v1018_v34 }
 0x3e1   : > { %v1124_v35 = vpop.f32.mrb[8].mxu1 }
 0x3e2   : > { %v3279_v36 = vadd.f32 %v2366_v28, %v1124_v35  ;;  %v2508_v37 = vpop.f32.mrb[9].mxu1 }
 0x3e3   : > { %v1127_v38 = vpop.f32.mrb[10].mxu1 }
 0x3e4   : > { %v2509_v39 = vpop.f32.mrb[11].mxu1  ;;  %v1130_v40 = vsel %vm971_vm3, %v3279_v36, -inf  ;;  %v1264_v38 = vsel %vm1032_vm4, %v1259_v58, 0 }
 0x3e5   : > { %1131 = vmax.xlane.f32.xlu1 %v1130_v40 }
 0x3e9   : > { %v1241_v41 = vpop.f32.mrb[12].mxu1 }
 0x3ea   : > { %v3283_v42 = vadd.f32 %v2366_v28, %v1241_v41  ;;  %v2520_v43 = vpop.f32.mrb[13].mxu1 }
 0x3eb   : > { %v1244_v44 = vpop.f32.mrb[14].mxu1 }
 0x3ec   : > { %v2521_v45 = vpop.f32.mrb[15].mxu1  ;;  %v1247_v46 = vsel %vm971_vm3, %v3283_v42, -inf }
 0x3ed   : > { %1248 = vmax.xlane.f32.xlu0 %v1247_v46 }
 0x3f1   : > { %v1357_v47 = vpop.f32.mrb[16].mxu1 }
 0x3f2   : > { %v3287_v48 = vadd.f32 %v2366_v28, %v1357_v47  ;;  %v2532_v49 = vpop.f32.mrb[17].mxu1 }
 0x3f3   : > { %v1360_v50 = vpop.f32.mrb[18].mxu1  ;;  %v1499_v49 = vsel %vm1032_vm4, %v3292_v53, 0 }
 0x3f4   : > { %v2533_v51 = vpop.f32.mrb[19].mxu1  ;;  %v1363_v52 = vsel %vm971_vm3, %v3287_v48, -inf }
 0x3f5   : > { %1364 = vmax.xlane.f32.xlu0 %v1363_v52 }
 0x3f6   : > { %1604 = vrot.lane.b32.xlu1 %v3292_v53, %s2904_s20  ;;  %s3560_s20 = sld [smem:[#allocation23_spill]] }
 0x3f9   : > { %v1477_v55 = vpop.f32.mrb[20].mxu1 }
 0x3fa   : > { %v3299_v56 = vadd.f32 %v2375_v54, %v1477_v55  ;;  %v2544_v57 = vpop.f32.mrb[21].mxu1 }
 0x3fb   : > { %v1480_v59 = vpop.f32.mrb[22].mxu1 }
 0x3fc   : > { %v2545_v60 = vpop.f32.mrb[23].mxu1  ;;  %v1483_v61 = vsel %vm971_vm3, %v3299_v56, -inf }
 0x3fd   : > { %1484 = vmax.xlane.f32.xlu0 %v1483_v61 }
 0x3ff   : > { %v1020_v62 = vpop.xlane.xlu0 %1019 }
 0x400   : > { %v1021_v63 = vsub.f32 %v1013_v30, %v1020_v62 }
 0x401   : > { %v1587_v0 = vpop.f32.mrb[24].mxu1 }
 0x402   : > { %v1022_v1 = vmul.f32 1.442695, %v1021_v63  ;;  %v2556_v5 = vpop.f32.mrb[25].mxu1  ;;  %v3320_v23 = vadd.f32 %v2375_v54, %v1587_v0 }
 0x403   : > { %v1590_v6 = vpop.f32.mrb[26].mxu1 }
 0x404   : > { %2709 = vpow2.f32 %v1022_v1  ;;  %v2557_v7 = vpop.f32.mrb[27].mxu1  ;;  %v1593_v25 = vsel %vm971_vm3, %v3320_v23, -inf }
 0x409   : > { %v1702_v8 = vpop.f32.mrb[28].mxu1 }
 0x40a   : > { %v2568_v9 = vpop.f32.mrb[29].mxu1  ;;  %v3314_v21 = vadd.f32 %v2375_v54, %v1702_v8 }
 0x40b   : > { %v1705_v10 = vpop.f32.mrb[30].mxu1 }
 0x40c   : > { %v2569_v11 = vpop.f32.mrb[31].mxu1  ;;  %v1708_v22 = vsel %vm971_vm3, %v3314_v21, -inf }
 0x40e   : > { %v3303_v12 = vpop.eup %2709 }
 0x40f   : > { %v1028_v14 = vpack.c.bf16 %v3303_v12, %v3303_v12 }
 0x411   : > { %2501 = vmatmul.mubr.msk.bf16.vlgmr.msra.gmra.mrb[8].mxu0 %vm971_vm3, %v1028_v14  ;;  %v1817_v16 = vpop.f32.mrb[32].mxu1  ;;  %v1024_v14 = vsel %vm971_vm3, %v3303_v12, 0.0 }
 0x412   : > { %2511 = vmatpush3.bf16.msra.mxu0 %v1148_v15  ;;  %v2580_v18 = vpop.f32.mrb[33].mxu1  ;;  %2512 = vmatprep.mubr.msk.bf16.mxu0 %vm2903_vm2, %v2902_v17  ;;  %v3322_v24 = vadd.f32 %v2375_v54, %v1817_v16 }
 0x413   : > { %v1820_v19 = vpop.f32.mrb[34].mxu1  ;;  %1374 = vrot.lane.b32.xlu0 %v3219_v4, %s2905_s2  ;;  %2522 = vmatprep.subr.bf16.mxu0 %v2902_v17 }
 0x414   : > { %v2581_v20 = vpop.f32.mrb[35].mxu1  ;;  %v1823_v4 = vsel %vm971_vm3, %v3322_v24, -inf }
 0x41a   : > { %1709 = vmax.xlane.f32.xlu1 %v1708_v22 }
 0x42b   : > { %1834 = vrot.lane.b32.xlu1 %v3292_v53, %s2905_s2  ;;  %s2088_s2 = scalar_lea.vmem %s3560_s20, %s2885_s1 }
 0x432   : > { %1594 = vmax.xlane.f32.xlu0 %v1593_v25 }
 0x436   : > { %1824 = vmax.xlane.f32.xlu0 %v1823_v4 }
 0x44c   : > { %1719 = vrot.lane.b32.xlu0 %v3292_v53, %s2906_s30  ;;  %s3418_s30 = scalar_lea.vmem %s3515_s16, %s2415_s21 }
 0x472   : > { %v1132_v26 = vpop.xlane.xlu1 %1131 }
 0x473   : > { %v1133_v27 = vsub.f32 %v3279_v36, %v1132_v26 }
 0x475   : > { %v1134_v28 = vmul.f32 1.442695, %v1133_v27 }
 0x476   : > { %v1605_v51 = vpop.permute.xlu1 %1604 }
 0x477   : > { %2711 = vpow2.f32 %v1134_v28  ;;  %v1610_v54 = vsel %vm1032_vm4, %v1605_v51, 0 }
 0x47a   : > { %v1249_v29 = vpop.xlane.xlu0 %1248 }
 0x47b   : > { %v1250_v30 = vsub.f32 %v3283_v42, %v1249_v29 }
 0x47d   : > { %v1251_v31 = vmul.f32 1.442695, %v1250_v30 }
 0x47f   : > { %2713 = vpow2.f32 %v1251_v31 }
 0x481   : > { %v2712_v32 = vpop.eup %2711 }
 0x482   : > { %v1365_v33 = vpop.xlane.xlu0 %1364  ;;  %v1136_v34 = vsel %vm971_vm3, %v2712_v32, 0.0  ;;  %v1140_v35 = vpack.c.bf16 %v2712_v32, %v2712_v32 }
 0x483   : > { %v1366_v37 = vsub.f32 %v3287_v48, %v1365_v33  ;;  %1137 = vadd.xlane.f32.xlu1 %v1136_v34 }
 0x484   : > { %2513 = vmatmul.mubr.msk.bf16.vlgmr.msra.gmra.mrb[12].mxu0 %vm971_vm3, %v1140_v35 }
 0x485   : > { %v1367_v36 = vmul.f32 1.442695, %v1366_v37  ;;  %2523 = vmatpush3.bf16.msra.mxu0 %v1264_v38  ;;  %2524 = vmatprep.mubr.msk.bf16.mxu0 %vm2903_vm2, %v2902_v17 }
 0x486   : > { %2534 = vmatprep.subr.bf16.mxu0 %v2902_v17 }
 0x487   : > { %2715 = vpow2.f32 %v1367_v36 }
 0x489   : > { %v2714_v39 = vpop.eup %2713 }
 0x48a   : > { %v1485_v40 = vpop.xlane.xlu0 %1484  ;;  %v1253_v41 = vsel %vm971_vm3, %v2714_v39, 0.0  ;;  %v1257_v42 = vpack.c.bf16 %v2714_v39, %v2714_v39 }
 0x48b   : > { %v1486_v43 = vsub.f32 %v3299_v56, %v1485_v40  ;;  %1254 = vadd.xlane.f32.xlu1 %v1253_v41 }
 0x48c   : > { %2525 = vmatmul.mubr.msk.bf16.vlgmr.msra.gmra.mrb[16].mxu0 %vm971_vm3, %v1257_v42 }
 0x48d   : > { %v1487_v44 = vmul.f32 1.442695, %v1486_v43  ;;  %2536 = vmatprep.mubr.msk.bf16.mxu0 %vm2903_vm2, %v2902_v17 }
 0x48e   : > { %v1375_v45 = vpop.permute.xlu0 %1374 }
 0x48f   : > { %2717 = vpow2.f32 %v1487_v44  ;;  %v1380_v46 = vsel %vm1032_vm4, %v1375_v45, 0 }
 0x490   : > { %2535 = vmatpush3.bf16.msra.mxu0 %v1380_v46 }
 0x491   : > { %v2716_v47 = vpop.eup %2715  ;;  %2546 = vmatprep.subr.bf16.mxu0 %v2902_v17 }
 0x492   : > { %v1373_v48 = vpack.c.bf16 %v2716_v47, %v2716_v47  ;;  %v1369_v10 = vsel %vm971_vm3, %v2716_v47, 0.0 }
 0x494   : > { %2537 = vmatmul.mubr.msk.bf16.vlgmr.msra.gmra.mrb[20].mxu0 %vm971_vm3, %v1373_v48 }
 0x495   : > { %2547 = vmatpush3.bf16.msra.mxu0 %v1499_v49  ;;  %2548 = vmatprep.mubr.msk.bf16.mxu0 %vm2903_vm2, %v2902_v17 }
 0x496   : > { %2558 = vmatprep.subr.bf16.mxu0 %v2902_v17 }
 0x499   : > { %v2718_v50 = vpop.eup %2717 }
 0x49a   : > { %v1493_v52 = vpack.c.bf16 %v2718_v50, %v2718_v50  ;;  %v1489_v15 = vsel %vm971_vm3, %v2718_v50, 0.0 }
 0x49c   : > { %2549 = vmatmul.mubr.msk.bf16.vlgmr.msra.gmra.mrb[24].mxu0 %vm971_vm3, %v1493_v52 }
 0x49d   : > { %2559 = vmatpush3.bf16.msra.mxu0 %v1610_v54  ;;  %2560 = vmatprep.mubr.msk.bf16.mxu0 %vm2903_vm2, %v2902_v17 }
 0x49e   : > { %2570 = vmatprep.subr.bf16.mxu0 %v2902_v17 }
 0x4a7   : > { %v1710_v53 = vpop.xlane.xlu1 %1709 }
 0x4a8   : > { %v1711_v55 = vsub.f32 %v3314_v21, %v1710_v53 }
 0x4aa   : > { %v1712_v56 = vmul.f32 1.442695, %v1711_v55 }
 0x4ab   : > { %v1835_v13 = vpop.permute.xlu1 %1834 }
 0x4ac   : > { %2719 = vpow2.f32 %v1712_v56  ;;  %v1840_v18 = vsel %vm1032_vm4, %v1835_v13, 0 }
 0x4b6   : > { %v2720_v57 = vpop.eup %2719 }
 0x4b7   : > { %v1714_v58 = vsel %vm971_vm3, %v2720_v57, 0.0  ;;  %v1718_v16 = vpack.c.bf16 %v2720_v57, %v2720_v57 }
 0x4b8   : > { %1715 = vadd.xlane.f32.xlu1 %v1714_v58 }
 0x4bf   : > { %v1595_v59 = vpop.xlane.xlu0 %1594 }
 0x4c0   : > { %v1596_v60 = vsub.f32 %v3320_v23, %v1595_v59 }
 0x4c2   : > { %v1597_v61 = vmul.f32 1.442695, %v1596_v60 }
 0x4c3   : > { %v1825_v62 = vpop.xlane.xlu0 %1824 }
 0x4c4   : > { %2721 = vpow2.f32 %v1597_v61  ;;  %v1826_v63 = vsub.f32 %v3322_v24, %v1825_v62  ;;  %v2697_v62 = vld [vmem:[%s751_s15] sm:$0xff]  }
 0x4c5   : > { %2589 = vmatpush3.bf16.msra.mxu1 %v2697_v62 }
 0x4c6   : > { %v1827_v0 = vmul.f32 1.442695, %v1826_v63  ;;  %2590 = vmatprep.subr.bf16.mxu1 %v2902_v17 }
 0x4c7   : > { %v1720_v5 = vpop.permute.xlu0 %1719 }
 0x4c8   : > { %2723 = vpow2.f32 %v1827_v0  ;;  %v1725_v8 = vsel %vm1032_vm4, %v1720_v5, 0 }
 0x4ce   : > { %v2722_v1 = vpop.eup %2721 }
 0x4cf   : > { %v1599_v6 = vsel %vm971_vm3, %v2722_v1, 0.0  ;;  %v1603_v7 = vpack.c.bf16 %v2722_v1, %v2722_v1 }
 0x4d0   : > { %1600 = vadd.xlane.f32.xlu0 %v1599_v6  ;;  %v2698_v6 = vld [vmem:[%s751_s15 + $0x8] sm:$0xff]  }
 0x4d1   : > { %2561 = vmatmul.mubr.msk.bf16.vlgmr.msra.gmra.mrb[28].mxu0 %vm971_vm3, %v1603_v7  ;;  %2591 = vmatpush3.bf16.msra.mxu1 %v2698_v6 }
 0x4d2   : > { %v2724_v9 = vpop.eup %2723  ;;  %2571 = vmatpush3.bf16.msra.mxu0 %v1725_v8  ;;  %2572 = vmatprep.mubr.msk.bf16.mxu0 %vm2903_vm2, %v2902_v17 }
 0x4d3   : > { %v1829_v11 = vsel %vm971_vm3, %v2724_v9, 0.0  ;;  %2582 = vmatprep.subr.bf16.mxu0 %v2902_v17  ;;  %v1833_v19 = vpack.c.bf16 %v2724_v9, %v2724_v9  ;;  %2604 = vmatprep.subr.bf16.mxu1 %v2902_v17 }
 0x4d4   : > { %1370 = vadd.xlane.f32.xlu0 %v1369_v10  ;;  %1830 = vadd.xlane.f32.xlu1 %v1829_v11 }
 0x4d8   : > { %1025 = vadd.xlane.f32.xlu0 %v1024_v14  ;;  %1490 = vadd.xlane.f32.xlu1 %v1489_v15 }
 0x4d9   : > { %2573 = vmatmul.mubr.msk.bf16.vlgmr.msra.gmra.mrb[32].mxu0 %vm971_vm3, %v1718_v16 }
 0x4da   : > { %2583 = vmatpush3.bf16.msra.mxu0 %v1840_v18  ;;  %2584 = vmatprep.mubr.msk.bf16.mxu0 %vm2903_vm2, %v2902_v17 }
 0x4db   : > { %2596 = vmatprep.subr.bf16.mxu0 %v2902_v17 }
 0x4e1   : > { %2585 = vmatmul.mubr.msk.bf16.vlgmr.msra.gmra.mrb[36].mxu0 %vm971_vm3, %v1833_v19 }
 0x4e2   : > { %2600 = vmatprep.mubr.msk.bf16.mxu0 %vm2903_vm2, %v2902_v17 }
 0x4e4   : > { %v1070_v12 = vpop.f32.mrb[8].mxu0 }
 0x4e5   : > { %v2502_v20 = vpop.f32.mrb[9].mxu0 }
 0x4e6   : > { %v1073_v21 = vpop.f32.mrb[10].mxu0 }
 0x4e7   : > { %v2503_v22 = vpop.f32.mrb[11].mxu0 }
 0x510   : > { %v1138_v23 = vpop.xlane.xlu1 %1137 }
 0x511   : > { %2725 = vrcp.f32 %v1138_v23 }
 0x518   : > { %v1255_v24 = vpop.xlane.xlu1 %1254 }
 0x519   : > { %2727 = vrcp.f32 %v1255_v24 }
 0x51b   : > { %v2726_v25 = vpop.eup %2725 }
 0x523   : > { %v2728_v32 = vpop.eup %2727 }
 0x545   : > { %v1716_v30 = vpop.xlane.xlu1 %1715 }
 0x557   : > { %v1184_v4 = vpop.f32.mrb[12].mxu0 }
 0x558   : > { %v1190_v26 = vmul.f32 %v2726_v25, %v1184_v4  ;;  %v2514_v27 = vpop.f32.mrb[13].mxu0  ;;  %v2384_v25 = vld [vmem:[%s1891_s29] ss:$0 sm:$0xff]  ;;  %s2010_s29 = scalar_lea.vmem %s3559_s22, %s2885_s1 }
 0x559   : > { %v1187_v28 = vpop.f32.mrb[14].mxu0 }
 0x55a   : > { %1192 = vrot.lane.b32.xlu0 %v1190_v26, %s2907_s26  ;;  %v2515_v29 = vpop.f32.mrb[15].mxu0 }
 0x55d   : > { %v1601_v31 = vpop.xlane.xlu0 %1600 }
 0x55f   : > { %v1300_v33 = vpop.f32.mrb[16].mxu0 }
 0x560   : > { %v1306_v34 = vmul.f32 %v2728_v32, %v1300_v33  ;;  %v2526_v35 = vpop.f32.mrb[17].mxu0 }
 0x561   : > { %v1371_v37 = vpop.xlane.xlu0 %1370  ;;  %v1831_v38 = vpop.xlane.xlu1 %1830 }
 0x562   : > { %2729 = vrcp.f32 %v1371_v37  ;;  %v1303_v36 = vpop.f32.mrb[18].mxu0  ;;  %1308 = vrot.lane.b32.xlu1 %v1306_v34, %s2908_s27 }
 0x563   : > { %v2527_v39 = vpop.f32.mrb[19].mxu0 }
 0x565   : > { %v1026_v40 = vpop.xlane.xlu0 %1025  ;;  %v1491_v41 = vpop.xlane.xlu1 %1490 }
 0x566   : > { %2731 = vrcp.f32 %v1026_v40 }
 0x567   : > { %2733 = vrcp.f32 %v1491_v41  ;;  %v1416_v42 = vpop.f32.mrb[20].mxu0 }
 0x568   : > { %v2538_v43 = vpop.f32.mrb[21].mxu0  ;;  %2735 = vrcp.f32 %v1601_v31 }
 0x569   : > { %v1419_v44 = vpop.f32.mrb[22].mxu0  ;;  %2737 = vrcp.f32 %v1716_v30  ;;  %v2699_v43 = vld [vmem:[%s2005_s0] sm:$0xff]  }
 0x56a   : > { %v2539_v45 = vpop.f32.mrb[23].mxu0  ;;  %2739 = vrcp.f32 %v1831_v38  ;;  %2597 = vmatpush3.bf16.msra.mxu0 %v2699_v43  ;;  %v2700_v44 = vld [vmem:[%s2005_s0 + $0x8] sm:$0xff]  }
 0x56b   : > { %2598 = vmatprep.subr.bf16.mxu0 %v2902_v17  ;;  %v2701_v45 = vld [vmem:[%s3418_s30] sm:$0xff]  }
 0x56c   : > { %v2730_v46 = vpop.eup %2729 }
 0x56d   : > { %v1422_v47 = vmul.f32 %v2730_v46, %v1416_v42  ;;  %v2702_v46 = vld [vmem:[%s3418_s30 + $0x8] sm:$0xff]  }
 0x56e   : > { %2599 = vmatpush3.bf16.msra.mxu0 %v2700_v44 }
 0x56f   : > { %1424 = vrot.lane.b32.xlu0 %v1422_v47, %s2909_s13  ;;  %v1535_v48 = vpop.f32.mrb[24].mxu0 }
 0x570   : > { %v2732_v49 = vpop.eup %2731  ;;  %v2550_v50 = vpop.f32.mrb[25].mxu0 }
 0x571   : > { %v2734_v51 = vpop.eup %2733  ;;  %v1538_v52 = vpop.f32.mrb[26].mxu0  ;;  %v1076_v54 = vmul.f32 %v2732_v49, %v1070_v12 }
 0x572   : > { %v1541_v53 = vmul.f32 %v2734_v51, %v1535_v48  ;;  %v2551_v55 = vpop.f32.mrb[27].mxu0  ;;  %v2736_v56 = vpop.eup %2735 }
 0x573   : > { %1077 = vst.msk [vmem:[#allocation3] sm:$0xff] %vm971_vm3, %v1076_v54  ;;  %v2738_v63 = vpop.eup %2737  ;;  %v2388_v55 = vld [vmem:[%s1957_s18] ss:$0 sm:$0xff] }
 0x574   : > { %1542 = vst.msk [vmem:[#allocation3 + $0x8] sm:$0xff] %vm971_vm3, %v1541_v53  ;;  %v2740_v9 = vpop.eup %2739 }
 0x5a4   : > { %v1646_v57 = vpop.f32.mrb[28].mxu0 }
 0x5a5   : > { %v1652_v58 = vmul.f32 %v2736_v56, %v1646_v57  ;;  %v2562_v59 = vpop.f32.mrb[29].mxu0 }
 0x5a6   : > { %v1649_v60 = vpop.f32.mrb[30].mxu0 }
 0x5a7   : > { %1654 = vrot.lane.b32.xlu1 %v1652_v58, %s2907_s26  ;;  %v2563_v61 = vpop.f32.mrb[31].mxu0 }
 0x5ac   : > { %v1761_v0 = vpop.f32.mrb[32].mxu0 }
 0x5ad   : > { %v1767_v1 = vmul.f32 %v2738_v63, %v1761_v0  ;;  %v2574_v5 = vpop.f32.mrb[33].mxu0  ;;  %v2703_v0 = vld [vmem:[%s3418_s30 + $0x10] sm:$0xff]  }
 0x5ae   : > { %v1764_v7 = vpop.f32.mrb[34].mxu0  ;;  %v2391_v5 = vld [vmem:[%s2010_s29] ss:$0 sm:$0xff] }
 0x5af   : > { %1769 = vrot.lane.b32.xlu1 %v1767_v1, %s2908_s27  ;;  %v2575_v8 = vpop.f32.mrb[35].mxu0  ;;  %s3558_s27 = sld [smem:[#allocation21_spill]]  ;;  %v2704_v1 = vld [vmem:[%s3418_s30 + $0x18] sm:$0xff]  }
 0x5b4   : > { %v1876_v10 = vpop.f32.mrb[36].mxu0 }
 0x5b5   : > { %v1882_v11 = vmul.f32 %v2740_v9, %v1876_v10  ;;  %v2586_v13 = vpop.f32.mrb[37].mxu0 }
 0x5b6   : > { %v1879_v14 = vpop.f32.mrb[38].mxu0 }
 0x5b7   : > { %1884 = vrot.lane.b32.xlu1 %v1882_v11, %s2909_s13  ;;  %v2587_v15 = vpop.f32.mrb[39].mxu0  ;;  %s1959_s13 = scalar_lea.vmem %s3558_s27, %s2885_s1 }
 0x5b8   : > { %v2389_v59 = vld [vmem:[%s1959_s13] ss:$0 sm:$0xff] }
 0x5cc   : > { %v1193_v16 = vpop.permute.xlu0 %1192 }
 0x5cd   : > { %1196 = vst.msk [vmem:[#allocation3] sm:$0xff] %vm1195_vm5, %v1193_v16 }
 0x5d4   : > { %v1309_v18 = vpop.permute.xlu1 %1308 }
 0x5d5   : > { %1312 = vst.msk [vmem:[#allocation3] sm:$0xff] %vm1311_vm6, %v1309_v18 }
 0x5e1   : > { %v1425_v19 = vpop.permute.xlu0 %1424 }
 0x5e2   : > { %1428 = vst.msk [vmem:[#allocation3] sm:$0xff] %vm1427_vm7, %v1425_v19 }
 0x5e9   : > { %v1888_v22 = vld [vmem:[#allocation3] sm:$0xff] }
 0x619   : > { %v1655_v12 = vpop.permute.xlu1 %1654 }
 0x61a   : > { %1657 = vst.msk [vmem:[#allocation3 + $0x8] sm:$0xff] %vm1195_vm5, %v1655_v12 }
 0x621   : > { %v1770_v20 = vpop.permute.xlu1 %1769 }
 0x622   : > { %1772 = vst.msk [vmem:[#allocation3 + $0x8] sm:$0xff] %vm1311_vm6, %v1770_v20 }
 0x629   : > { %v1885_v21 = vpop.permute.xlu1 %1884 }
 0x62a   : > { %1887 = vst.msk [vmem:[#allocation3 + $0x8] sm:$0xff] %vm1427_vm7, %v1885_v21 }
 0x631   : > { %v1889_v23 = vld [vmem:[#allocation3 + $0x8] sm:$0xff] }
 0x632   : > { %v1890_v24 = vpack.c.bf16 %v1889_v23, %v1888_v22 }
 0x634   : > { %2593 = vmatmul.mubr.msk.bf16.vlgmr.msra.gmra.mrb[36].mxu1 %vm704_vm1, %v1890_v24 }
 0x635   : > { %2612 = vmatprep.mubr.msk.bf16.mxu1 %vm2903_vm2, %v2902_v17  ;;  %2605 = vmatpush3.bf16.msra.mxu1 %v2701_v45 }
 0x636   : > { %2606 = vmatprep.subr.bf16.mxu1 %v2902_v17 }
 0x639   : > { %2607 = vmatpush3.bf16.msra.mxu1 %v2702_v46 }
 0x63a   : > { %2608 = vmatprep.subr.bf16.mxu1 %v2902_v17 }
 0x63d   : > { %2609 = vmatpush3.bf16.msra.mxu1 %v2703_v0 }
 0x63e   : > { %2610 = vmatprep.subr.bf16.mxu1 %v2902_v17  ;;  %v2397_v17 = vld [vmem:[%s2088_s2] ss:$0 sm:$0xff] }
 0x641   : > { %2611 = vmatpush3.bf16.msra.mxu1 %v2704_v1 }
 0x707   : > { %v1948_v4 = vpop.f32.mrb[36].mxu1 }
 0x708   : > { %v1949_v26 = vadd.f32 %v2384_v25, %v1948_v4  ;;  %v2594_v27 = vpop.f32.mrb[37].mxu1 }
 0x709   : > { %v1951_v28 = vpop.f32.mrb[38].mxu1 }
 0x70a   : > { %v3399_v29 = vadd.f32 %v1949_v26, %v3146_v2  ;;  %v1952_v30 = vadd.f32 %v2384_v25, %v1951_v28  ;;  %v2595_v31 = vpop.f32.mrb[39].mxu1 }
 0x70c   : > { %v3402_v32 = vadd.f32 %v1952_v30, %v3148_v3  ;;  %v1961_v33 = vsel %vm704_vm1, %v3399_v29, 0.0 }
 0x70d   : > { %1962 = vadd.xlane.f32.xlu0 %v1961_v33 }
 0x70e   : > { %v1964_v34 = vsel %vm704_vm1, %v3402_v32, 0.0 }
 0x70f   : > { %1965 = vadd.xlane.f32.xlu1 %v1964_v34 }
 0x79a   : > { %v1963_v35 = vpop.xlane.xlu0 %1962 }
 0x79b   : > { %v1967_v37 = vmul.f32 0.03125, %v1963_v35 }
 0x79c   : > { %v1966_v38 = vpop.xlane.xlu1 %1965 }
 0x79d   : > { %v1969_v2 = vsub.f32 %v3399_v29, %v1967_v37  ;;  %v1968_v36 = vmul.f32 0.03125, %v1966_v38 }
 0x79f   : > { %v1970_v39 = vsub.f32 %v3402_v32, %v1968_v36  ;;  %v1971_v3 = vmul.f32 %v1969_v2, %v1969_v2 }
 0x7a1   : > { %v1973_v40 = vsel %vm704_vm1, %v1971_v3, 0.0  ;;  %v1972_v41 = vmul.f32 %v1970_v39, %v1970_v39 }
 0x7a2   : > { %1974 = vadd.xlane.f32.xlu0 %v1973_v40  ;;  %v2404_v40 = vld [vmem:[%s3561_s23] ss:$0 sm:$0xff] (!%p2403_p5) }
 0x7a3   : > { %v1976_v42 = vsel %vm704_vm1, %v1972_v41, 0.0 }
 0x7a6   : > { %1977 = vadd.xlane.f32.xlu0 %v1976_v42  ;;  %v2405_v42 = vld [vmem:[%s3562_s19] ss:$0 sm:$0xff] (!%p2403_p5) }
 0x82f   : > { %v1975_v47 = vpop.xlane.xlu0 %1974 }
 0x830   : > { %v1979_v48 = vmul.f32 0.03125, %v1975_v47 }
 0x832   : > { %v1981_v49 = vadd.f32 1e-06, %v1979_v48 }
 0x833   : > { %v1978_v50 = vpop.xlane.xlu0 %1977 }
 0x834   : > { %2741 = vrsqrt.f32 %v1981_v49  ;;  %v1980_v51 = vmul.f32 0.03125, %v1978_v50 }
 0x836   : > { %v1982_v52 = vadd.f32 1e-06, %v1980_v51 }
 0x838   : > { %2743 = vrsqrt.f32 %v1982_v52 }
 0x83e   : > { %v2742_v54 = vpop.eup %2741 }
 0x83f   : > { %v1985_v53 = vmul.f32 %v2742_v54, %v1969_v2 }
 0x841   : > { %v1993_v57 = vmul.f32 %v2388_v55, %v1985_v53 }
 0x842   : > { %v2744_v56 = vpop.eup %2743 }
 0x843   : > { %v1986_v58 = vmul.f32 %v2744_v56, %v1970_v39  ;;  %v2001_v61 = vadd.f32 %v2389_v59, %v1993_v57 }
 0x845   : > { %v1994_v60 = vmul.f32 %v2388_v55, %v1986_v58 }
 0x847   : > { %v2002_v62 = vadd.f32 %v2389_v59, %v1994_v60 }
 0x849   : > { %v2003_v63 = vpack.c.bf16 %v2002_v62, %v2001_v61 }
 0x84b   : > { %2601 = vmatmul.mubr.msk.bf16.vlgmr.msra.gmra.mrb[40].mxu0 %vm704_vm1, %v2003_v63 }
 0x91e   : > { %v2067_v6 = vpop.f32.mrb[40].mxu0 }
 0x91f   : > { %v2068_v7 = vadd.f32 %v2391_v5, %v2067_v6  ;;  %v2602_v8 = vpop.f32.mrb[41].mxu0 }
 0x920   : > { %v2070_v9 = vpop.f32.mrb[42].mxu0 }
 0x921   : > { %v2071_v10 = vadd.f32 %v2391_v5, %v2070_v9  ;;  %v2603_v11 = vpop.f32.mrb[43].mxu0  ;;  %v2074_v13 = vmax.f32 %v2068_v7, 0.0 }
 0x923   : > { %v2075_v14 = vmax.f32 %v2071_v10, 0.0 }
 0x925   : > { %v2076_v15 = vpack.c.bf16 %v2075_v14, %v2074_v13 }
 0x927   : > { %2613 = vmatmul.mubr.msk.bf16.vlgmr.msra.gmra.mrb[40].mxu1 %vm2120_vm8, %v2076_v15 }
 0x9fa   : > { %v2158_v16 = vpop.f32.mrb[40].mxu1 }
 0x9fb   : > { %v2159_v18 = vadd.f32 %v2397_v17, %v2158_v16  ;;  %v2614_v19 = vpop.f32.mrb[41].mxu1  ;;  %2172 = sbr.rel (%p2403_p5) target bundleno = 2877 (0xb3d), region = 120 }
 0x9fc   : > { %v2161_v12 = vpop.f32.mrb[42].mxu1 }
 0x9fd   : > { %v2165_v20 = vadd.f32 %v2159_v18, %v3399_v29  ;;  %v2162_v21 = vadd.f32 %v2397_v17, %v2161_v12  ;;  %v2615_v22 = vpop.f32.mrb[43].mxu1 }
 0x9ff   : > { %2167 = vst.msk [vmem:[#allocation2] sm:$0xff] %vm704_vm1, %v2165_v20  ;;  %v2166_v23 = vadd.f32 %v2162_v21, %v3402_v32  ;;  %v2175_v24 = vsel (!%p2403_p5), %vm704_vm1, %v2165_v20, 0.0 }
 0xa00   : > { %2176 = vadd.xlane.f32.xlu0 (!%p2403_p5), %v2175_v24 }
 0xa01   : > { %2168 = vst.msk [vmem:[#allocation2 + $0x8] sm:$0xff] %vm704_vm1, %v2166_v23  ;;  %v2178_v25 = vsel (!%p2403_p5), %vm704_vm1, %v2166_v23, 0.0 }
 0xa04   : > { %2179 = vadd.xlane.f32.xlu0 %v2178_v25 }
 0xa8d   : > { %v2177_v4 = vpop.xlane.xlu0 %2176 }
 0xa8e   : > { %v2181_v26 = vmul.f32 0.03125, %v2177_v4 }
 0xa90   : > { %v2183_v27 = vsub.f32 %v2165_v20, %v2181_v26 }
 0xa91   : > { %v2180_v28 = vpop.xlane.xlu0 %2179 }
 0xa92   : > { %v2182_v29 = vmul.f32 0.03125, %v2180_v28  ;;  %v2185_v30 = vmul.f32 %v2183_v27, %v2183_v27 }
 0xa94   : > { %v2184_v31 = vsub.f32 %v2166_v23, %v2182_v29  ;;  %v2187_v32 = vsel %vm704_vm1, %v2185_v30, 0.0 }
 0xa95   : > { %2188 = vadd.xlane.f32.xlu1 %v2187_v32 }
 0xa96   : > { %v2186_v33 = vmul.f32 %v2184_v31, %v2184_v31 }
 0xa98   : > { %v2190_v34 = vsel %vm704_vm1, %v2186_v33, 0.0 }
 0xa99   : > { %2191 = vadd.xlane.f32.xlu1 %v2190_v34 }
 0xb22   : > { %v2189_v35 = vpop.xlane.xlu1 %2188 }
 0xb23   : > { %v2193_v37 = vmul.f32 0.03125, %v2189_v35 }
 0xb25   : > { %v2195_v38 = vadd.f32 1e-06, %v2193_v37 }
 0xb26   : > { %v2192_v2 = vpop.xlane.xlu1 %2191 }
 0xb27   : > { %2745 = vrsqrt.f32 %v2195_v38  ;;  %v2194_v36 = vmul.f32 0.03125, %v2192_v2 }
 0xb29   : > { %v2196_v39 = vadd.f32 1e-06, %v2194_v36 }
 0xb2b   : > { %2747 = vrsqrt.f32 %v2196_v39 }
 0xb31   : > { %v2746_v3 = vpop.eup %2745 }
 0xb32   : > { %v2199_v41 = vmul.f32 %v2746_v3, %v2183_v27 }
 0xb34   : > { %v2207_v43 = vmul.f32 %v2404_v40, %v2199_v41 }
 0xb35   : > { %v2748_v44 = vpop.eup %2747 }
 0xb36   : > { %v2215_v45 = vadd.f32 %v2405_v42, %v2207_v43  ;;  %v2200_v46 = vmul.f32 %v2748_v44, %v2184_v31 }
 0xb38   : > { %2217 = vst.msk [vmem:[#allocation10] sm:$0xff] %vm704_vm1, %v2215_v45  ;;  %v2208_v47 = vmul.f32 %v2404_v40, %v2200_v46 }
 0xb3a   : > { %v2216_v48 = vadd.f32 %v2405_v42, %v2208_v47 }
 0xb3c   : > { %2218 = vst.msk [vmem:[#allocation10 + $0x8] sm:$0xff] %vm704_vm1, %v2216_v48 }
 0xb3d PF: > { %s3563_s3 = sld [smem:[#allocation15_spill]]  ;;  %s2910_s15 = smov [#allocation10]  }
 0xb3e   : > { %s2228_s4 = sshll.u32 %s2910_s15, 4  ;;  %s2229_s4 = int_to_ptr.vmem [resolvable:$true] %s2228_s4 }
 0xb3f   : > { %s2833_s22 = scalar_lea.vmem %s2229_s4, 256  ;;  %p2840_p6 = scmp.lt.s32.totalorder %s2229_s4, %s2229_s4 }
 0xb40   : > { %p2834_p11 = scmp.ne.s32.totalorder %s2229_s4, %s2833_s22  ;;  %p2841_p0 = scmp.lt.s32.totalorder %s2833_s22, %s2833_s22 }
 0xb42   : > { %p2842_p1 = por %p2841_p0, %p2840_p6 }
 0xb43   : > { %s3564_s27 = sadd.s32 4294967295, %s3563_s3  }
 0xb44   : > { %p3463_p10 = scmp.eq.s32.totalorder %s3564_s27, 1 }
 0xb46   : > { %p2835_p12 = pnand %p2834_p11, %p3463_p10 }
 0xb48   : > { %p2836_p13 = pneg %p2835_p12 }
 0xb4a   : > { %p2843_p4 = pnand %p2842_p1, %p2836_p13 }
 0xb4c   : > { %2846 = shalt.err (!%p2843_p4)
}
 0xb4d   : > { %s3566_s21 = sld [smem:[#allocation26_spill]] }
 0xb53   : > { %s2847_s20 = scalar_lea.hbm %s3566_s21, 256 }
 0xb54   : > { %p2848_p7 = scmp.ne.s32.totalorder %s3566_s21, %s2847_s20  ;;  %p2853_p8 = scmp.lt.u32.totalorder %s2847_s20, %s3566_s21 }
 0xb56   : > { %p2849_p9 = pnand %p2848_p7, %p3463_p10 }
 0xb58   : > { %p2850_p3 = pneg %p2849_p9 }
 0xb5a   : > { %p2855_p2 = pnand %p2853_p8, %p2850_p3 }
 0xb5c   : > { %2858 = shalt.err (!%p2855_p2)
}
 0xb5d   : > { %s2911_s17 = smov 128  }
 0xb5e   : > { %2629 = dma.vmem_to_hbm [thread:$0]  (%p3463_p10), %s2229_s4, 256, %s3566_s21, [#allocation6], %s2911_s17, %s2911_s17, %s2907_s26  }
 0xb5f   : > { %2880 = dma.done.wait (%p3463_p10), [#allocation6], 256  }
 0xb60   : > { %2882 = vsyncadd (%p3463_p10), [#allocation6], 4294967040 }
 0xb61 PF: > { %s3567_s3 = sld [smem:[#allocation15_spill]]  ;;  %s3568_s1 = sld [smem:[#allocation14_spill]] }
 0xb62   : > { %s3569_s22 = smov %s3571_s28 }
 0xb67   : > { %s33_s23 = sadd.s32 1, %s3567_s3  }
 0xb68   : > { %p30_p5 = scmp.ge.s32.totalorder %s33_s23, 4  }
 0xb6a   :  { %32 = sbr.rel (!%p30_p5) target bundleno = 16 (0x10), region = 166 }
 0xb71   :  { %2244 = vsyncpa [#allocation5], 1 }
 0xb72   :  { %2246 = vsyncpa [#allocation5 + $0x1], 1 }
 0xb73   :  { %2247 = vsyncpa [#allocation8], 1 }
 0xb74   :  { %2248 = vsyncpa [#allocation6], 1 }
 0xb75   :  { %2250 = vsyncpa [#allocation6 + $0x1], 1 }

</bundles_post_ra>
